<compile_context>
chip_gen: v7x
topology: tpu7x:2x2x1
jax: 0.10.0
libtpu: 0.0.40
codegen_flags: <defaults>
</compile_context>

<pallas_src>
import functools

import numpy as np
import jax
import jax.numpy as jnp
from jax.experimental import pallas as pl
from jax.experimental.pallas import tpu as pltpu

K1 = 15      # conv1 taps along W
K2 = 15      # conv2 taps along H
PAD1 = 7
PAD2 = 7
EPS = 1e-5


# --------------------------- Pallas kernel ----------------------------------
def basic_block_kernel(x_ref, w1_ref, w2_ref, pn_ref,
                       g1_ref, b1_ref, g2_ref, b2_ref, out_ref):
    H, L = out_ref.shape                       # (16, 128) lane-dense slab
    cdims = (((1,), (0,)), ((), ()))

    x = x_ref[...]                             # (H, L) -- also the residual

    # ---- conv1 (1x15 along W): one matmul against the banded, batch-block-diag
    # weight (zero padding already folded into the weight). ----
    y1 = jax.lax.dot_general(x, w1_ref[...], cdims,
                             preferred_element_type=jnp.float32)   # (H, L)

    # ---- bn1 (training-mode batch stats, fused single pass) + relu ----
    s1 = jnp.sum(y1, axis=0, keepdims=True)                        # (1, L)
    q1 = jnp.sum(y1 * y1, axis=0, keepdims=True)
    mean1 = jax.lax.dot_general(s1, pn_ref[...], cdims,
                                preferred_element_type=jnp.float32)
    ex2_1 = jax.lax.dot_general(q1, pn_ref[...], cdims,
                                preferred_element_type=jnp.float32)
    var1 = ex2_1 - mean1 * mean1
    scale1 = g1_ref[...] * jax.lax.rsqrt(var1 + EPS)
    shift1 = b1_ref[...] - mean1 * scale1
    mid = jnp.maximum(y1 * scale1 + shift1, 0.0)                   # (H, L)

    # ---- conv2 (15x1 along H): build the concat-of-H-shifts operand with
    # sublane rolls (XLU) + halo masks, then ONE stacked matmul.  No scratch. ----
    row = jax.lax.broadcasted_iota(jnp.int32, (H, L), 0)
    shifts = []
    for k in range(K2):
        d = k - PAD2                                   # need mid[h + d] (zero outside)
        if d == 0:
            shifts.append(mid)
        else:
            sh = pltpu.roll(mid, shift=(-d) % H, axis=0)   # sh[h] = mid[(h + d) % H]
            src = row + d
            valid = jnp.logical_and(src >= 0, src < H)
            shifts.append(jnp.where(valid, sh, 0.0))
    x2 = jnp.concatenate(shifts, axis=-1)                  # (H, K2*L), 128-aligned pieces
    y2 = jax.lax.dot_general(x2, w2_ref[...], cdims,
                             preferred_element_type=jnp.float32)   # (H, L)

    # ---- bn2 (fused stats) + residual add + relu ----
    s2 = jnp.sum(y2, axis=0, keepdims=True)
    q2 = jnp.sum(y2 * y2, axis=0, keepdims=True)
    mean2 = jax.lax.dot_general(s2, pn_ref[...], cdims,
                                preferred_element_type=jnp.float32)
    ex2_2 = jax.lax.dot_general(q2, pn_ref[...], cdims,
                                preferred_element_type=jnp.float32)
    var2 = ex2_2 - mean2 * mean2
    scale2 = g2_ref[...] * jax.lax.rsqrt(var2 + EPS)
    shift2 = b2_ref[...] - mean2 * scale2
    out_ref[...] = jnp.maximum(y2 * scale2 + shift2 + x, 0.0)


# ---------------- host-side (one-time) weight preprocessing -------------------
def _build_conv1_matrix(w1, N, W):
    """w1: (K1, Cin, C) taps -> (N*W*Cin, N*W*C) banded, batch-block-diag weight.
    Zero padding along W is folded in (out-of-range taps simply contribute 0)."""
    K1_, Cin, C = w1.shape
    m = np.zeros((N, W, Cin, N, W, C), np.float32)
    for n in range(N):
        for k in range(K1_):
            for wo in range(W):
                wi = wo + k - PAD1
                if 0 <= wi < W:
                    m[n, wi, :, n, wo, :] = w1[k]
    return m.reshape(N * W * Cin, N * W * C)


def _build_conv2_matrix(w2, N, W):
    """w2: (K2, Cin, C) taps -> (K2*N*W*Cin, N*W*C) stacked per-tap block-diag weight."""
    K2_, Cin, C = w2.shape
    m = np.zeros((K2_, N, W, Cin, N, W, C), np.float32)
    for n in range(N):
        for w in range(W):
            m[:, n, w, :, n, w, :] = w2
    return m.reshape(K2_ * N * W * Cin, N * W * C)


def _build_channel_broadcast(N, H, W, C):
    """(L, L) matrix: per-channel sum over lanes, divided by N*H*W, broadcast back."""
    col = np.arange(N * W * C)
    return ((col[:, None] % C) == (col[None, :] % C)).astype(np.float32) / float(N * H * W)


def prepare_basic_block_params(w1_pt, w2_pt, g1, b1, g2, b2, *, N, H, W):
    """Run once per weight set (host side): fold convs into dense matmul weights."""
    w1_pt = np.asarray(w1_pt, np.float32)              # (Cout, Cin, 1, K1)
    w2_pt = np.asarray(w2_pt, np.float32)              # (Cout, Cin, K2, 1)
    C = w1_pt.shape[0]
    w1 = np.transpose(w1_pt[:, :, 0, :], (2, 1, 0))    # (K1, Cin, Cout)
    w2 = np.transpose(w2_pt[:, :, :, 0], (2, 1, 0))    # (K2, Cin, Cout)

    def tile(v):
        return np.tile(np.asarray(v, np.float32).reshape(1, C), (1, N * W))

    return dict(
        w1m=jnp.asarray(_build_conv1_matrix(w1, N, W)),
        w2m=jnp.asarray(_build_conv2_matrix(w2, N, W)),
        pn=jnp.asarray(_build_channel_broadcast(N, H, W, C)),
        g1t=jnp.asarray(tile(g1)), b1t=jnp.asarray(tile(b1)),
        g2t=jnp.asarray(tile(g2)), b2t=jnp.asarray(tile(b2)),
    )


# ------------------------------ jitted apply ---------------------------------
@functools.partial(jax.jit)
def _basic_block_apply(x_nchw, w1m, w2m, pn, g1t, b1t, g2t, b2t):
    N, C, H, W = x_nchw.shape
    L = N * W * C

    # NCHW -> lane-dense (H, N*W*C) slab; no padded columns are materialized.
    x_slab = jnp.transpose(x_nchw, (2, 0, 3, 1)).reshape(H, L)

    out_slab = pl.pallas_call(
        basic_block_kernel,
        out_shape=jax.ShapeDtypeStruct((H, L), jnp.float32),
        grid=(1,),
        in_specs=[
            pl.BlockSpec((H, L), lambda i: (0, 0)),
            pl.BlockSpec((L, L), lambda i: (0, 0)),
            pl.BlockSpec((K2 * L, L), lambda i: (0, 0)),
            pl.BlockSpec((L, L), lambda i: (0, 0)),
            pl.BlockSpec((1, L), lambda i: (0, 0)),
            pl.BlockSpec((1, L), lambda i: (0, 0)),
            pl.BlockSpec((1, L), lambda i: (0, 0)),
            pl.BlockSpec((1, L), lambda i: (0, 0)),
        ],
        out_specs=pl.BlockSpec((H, L), lambda i: (0, 0)),
        compiler_params=pltpu.CompilerParams(
            dimension_semantics=("arbitrary",)),
    )(x_slab, w1m, w2m, pn, g1t, b1t, g2t, b2t)

    # (H, N*W*C) -> (N, C, H, W)
    return jnp.transpose(out_slab.reshape(H, N, W, C), (1, 3, 0, 2))


def basic_block_forward(x_nchw, params):
    return _basic_block_apply(x_nchw, params["w1m"], params["w2m"], params["pn"],
                              params["g1t"], params["b1t"], params["g2t"], params["b2t"])


# ---------------- pure-JAX reference (PyTorch semantics, NCHW) ----------------
def _bn_train(x, g, b):
    mean = jnp.mean(x, axis=(0, 2, 3), keepdims=True)
    var = jnp.mean((x - mean) ** 2, axis=(0, 2, 3), keepdims=True)
    return (x - mean) * jax.lax.rsqrt(var + EPS) * g.reshape(1, -1, 1, 1) \
        + b.reshape(1, -1, 1, 1)


def ref_forward(x, w1_pt, w2_pt, g1, b1, g2, b2):
    dn = ("NCHW", "OIHW", "NCHW")
    out = jax.lax.conv_general_dilated(
        x, w1_pt, (1, 1), ((0, 0), (PAD1, PAD1)), dimension_numbers=dn,
        precision=jax.lax.Precision.HIGHEST)
    out = jnp.maximum(_bn_train(out, g1, b1), 0.0)
    out = jax.lax.conv_general_dilated(
        out, w2_pt, (1, 1), ((PAD2, PAD2), (0, 0)), dimension_numbers=dn,
        precision=jax.lax.Precision.HIGHEST)
    out = _bn_train(out, g2, b2)
    return jnp.maximum(out + x, 0.0)


if __name__ == "__main__":
    key = jax.random.PRNGKey(0)
    N, C, H, W = 2, 4, 16, 16       # inplanes = planes = 4; N*W*C = 128 lanes
    k_x, k_w1, k_w2, k_g1, k_b1, k_g2, k_b2 = jax.random.split(key, 7)

    x = jax.random.normal(k_x, (N, C, H, W), jnp.float32)
    # PyTorch-layout weights (Cout, Cin, kH, kW)
    w1_pt = jax.random.normal(k_w1, (C, C, 1, K1), jnp.float32) * 0.1
    w2_pt = jax.random.normal(k_w2, (C, C, K2, 1), jnp.float32) * 0.1
    g1 = 1.0 + 0.1 * jax.random.normal(k_g1, (C,), jnp.float32)
    b1 = 0.05 * jax.random.normal(k_b1, (C,), jnp.float32)
    g2 = 1.0 + 0.1 * jax.random.normal(k_g2, (C,), jnp.float32)
    b2 = 0.05 * jax.random.normal(k_b2, (C,), jnp.float32)

    params = prepare_basic_block_params(w1_pt, w2_pt, g1, b1, g2, b2, N=N, H=H, W=W)

    out = basic_block_forward(x, params)
    out = jax.block_until_ready(out)

    ref = ref_forward(x, w1_pt, w2_pt, g1, b1, g2, b2)
    assert out.shape == (N, C, H, W)
    max_err = float(jnp.max(jnp.abs(out - ref)))
    assert jnp.allclose(out, ref, rtol=2e-3, atol=2e-3), max_err

    print("KERNEL_OK")
</pallas_src>

<mosaic_0001>
module attributes {stable_mosaic.version = 11 : i64} {
  func.func @basic_block_kernel(%arg0: i32, %arg1: memref<16x128xf32, #tpu.memory_space<vmem>>, %arg2: memref<128x128xf32, #tpu.memory_space<vmem>>, %arg3: memref<1920x128xf32, #tpu.memory_space<vmem>>, %arg4: memref<128x128xf32, #tpu.memory_space<vmem>>, %arg5: memref<1x128xf32, #tpu.memory_space<vmem>>, %arg6: memref<1x128xf32, #tpu.memory_space<vmem>>, %arg7: memref<1x128xf32, #tpu.memory_space<vmem>>, %arg8: memref<1x128xf32, #tpu.memory_space<vmem>>, %arg9: memref<16x128xf32, #tpu.memory_space<vmem>>) attributes {dimension_semantics = [#tpu.dimension_semantics<arbitrary>], iteration_bounds = array<i64: 1>, scalar_prefetch = 0 : i64, scratch_operands = 0 : i64, tpu.core_type = #tpu.core_type<tc>, window_params = [{pipeline_mode = #tpu.pipeline_mode<synchronous>, transform_indices = @transform_0, window_bounds = array<i64: 16, 128>}, {pipeline_mode = #tpu.pipeline_mode<synchronous>, transform_indices = @transform_1, window_bounds = array<i64: 128, 128>}, {pipeline_mode = #tpu.pipeline_mode<synchronous>, transform_indices = @transform_2, window_bounds = array<i64: 1920, 128>}, {pipeline_mode = #tpu.pipeline_mode<synchronous>, transform_indices = @transform_3, window_bounds = array<i64: 128, 128>}, {pipeline_mode = #tpu.pipeline_mode<synchronous>, transform_indices = @transform_4, window_bounds = array<i64: 1, 128>}, {pipeline_mode = #tpu.pipeline_mode<synchronous>, transform_indices = @transform_5, window_bounds = array<i64: 1, 128>}, {pipeline_mode = #tpu.pipeline_mode<synchronous>, transform_indices = @transform_6, window_bounds = array<i64: 1, 128>}, {pipeline_mode = #tpu.pipeline_mode<synchronous>, transform_indices = @transform_7, window_bounds = array<i64: 1, 128>}, {pipeline_mode = #tpu.pipeline_mode<synchronous>, transform_indices = @transform_8, window_bounds = array<i64: 16, 128>}]} {
    %c0 = arith.constant 0 : index
    %c0_0 = arith.constant 0 : index
    %0 = vector.load %arg1[%c0, %c0_0] : memref<16x128xf32, #tpu.memory_space<vmem>>, vector<16x128xf32>
    %c0_1 = arith.constant 0 : index
    %c0_2 = arith.constant 0 : index
    %1 = vector.load %arg2[%c0_1, %c0_2] : memref<128x128xf32, #tpu.memory_space<vmem>>, vector<128x128xf32>
    %cst = arith.constant dense<0.000000e+00> : vector<16x128xf32>
    %2 = tpu.matmul %0, %1, %cst {dimension_numbers = #tpu.dot_dimension_numbers<[1], [0], [0], [1], [0, 0, 1, 1], [], []>} : vector<16x128xf32>, vector<128x128xf32>, vector<16x128xf32> -> vector<16x128xf32>
    %cst_3 = arith.constant dense<0.000000e+00> : vector<128xf32>
    %3 = vector.multi_reduction <add>, %2, %cst_3 [0] : vector<16x128xf32> to vector<128xf32>
    %4 = vector.shape_cast %3 : vector<128xf32> to vector<1x128xf32>
    %5 = arith.mulf %2, %2 : vector<16x128xf32>
    %cst_4 = arith.constant dense<0.000000e+00> : vector<128xf32>
    %6 = vector.multi_reduction <add>, %5, %cst_4 [0] : vector<16x128xf32> to vector<128xf32>
    %7 = vector.shape_cast %6 : vector<128xf32> to vector<1x128xf32>
    %c0_5 = arith.constant 0 : index
    %c0_6 = arith.constant 0 : index
    %8 = vector.load %arg4[%c0_5, %c0_6] : memref<128x128xf32, #tpu.memory_space<vmem>>, vector<128x128xf32>
    %cst_7 = arith.constant dense<0.000000e+00> : vector<1x128xf32>
    %9 = tpu.matmul %4, %8, %cst_7 {dimension_numbers = #tpu.dot_dimension_numbers<[1], [0], [0], [1], [0, 0, 1, 1], [], []>} : vector<1x128xf32>, vector<128x128xf32>, vector<1x128xf32> -> vector<1x128xf32>
    %c0_8 = arith.constant 0 : index
    %c0_9 = arith.constant 0 : index
    %10 = vector.load %arg4[%c0_8, %c0_9] : memref<128x128xf32, #tpu.memory_space<vmem>>, vector<128x128xf32>
    %cst_10 = arith.constant dense<0.000000e+00> : vector<1x128xf32>
    %11 = tpu.matmul %7, %10, %cst_10 {dimension_numbers = #tpu.dot_dimension_numbers<[1], [0], [0], [1], [0, 0, 1, 1], [], []>} : vector<1x128xf32>, vector<128x128xf32>, vector<1x128xf32> -> vector<1x128xf32>
    %12 = arith.mulf %9, %9 : vector<1x128xf32>
    %13 = arith.subf %11, %12 : vector<1x128xf32>
    %c0_11 = arith.constant 0 : index
    %c0_12 = arith.constant 0 : index
    %14 = vector.load %arg5[%c0_11, %c0_12] : memref<1x128xf32, #tpu.memory_space<vmem>>, vector<1x128xf32>
    %cst_13 = arith.constant 9.99999974E-6 : f32
    %15 = vector.broadcast %cst_13 : f32 to vector<1x128xf32>
    %16 = arith.addf %13, %15 : vector<1x128xf32>
    %17 = math.rsqrt %16 : vector<1x128xf32>
    %18 = arith.mulf %14, %17 : vector<1x128xf32>
    %c0_14 = arith.constant 0 : index
    %c0_15 = arith.constant 0 : index
    %19 = vector.load %arg6[%c0_14, %c0_15] : memref<1x128xf32, #tpu.memory_space<vmem>>, vector<1x128xf32>
    %20 = arith.mulf %9, %18 : vector<1x128xf32>
    %21 = arith.subf %19, %20 : vector<1x128xf32>
    %22 = vector.broadcast %18 : vector<1x128xf32> to vector<16x128xf32>
    %23 = arith.mulf %2, %22 : vector<16x128xf32>
    %24 = vector.broadcast %21 : vector<1x128xf32> to vector<16x128xf32>
    %25 = arith.addf %23, %24 : vector<16x128xf32>
    %cst_16 = arith.constant 0.000000e+00 : f32
    %26 = vector.broadcast %cst_16 : f32 to vector<16x128xf32>
    %27 = arith.maximumf %25, %26 : vector<16x128xf32>
    %28 = tpu.iota {dimensions = array<i32: 0>} : vector<16x128xi32>
    %c7_i32 = arith.constant 7 : i32
    %29 = tpu.dynamic_rotate %27 by %c7_i32 dim 0 : vector<16x128xf32>, i32 -> vector<16x128xf32>
    %c-7_i32 = arith.constant -7 : i32
    %30 = vector.broadcast %c-7_i32 : i32 to vector<16x128xi32>
    %31 = arith.addi %28, %30 : vector<16x128xi32>
    %c0_i32 = arith.constant 0 : i32
    %32 = vector.broadcast %c0_i32 : i32 to vector<16x128xi32>
    %33 = arith.cmpi sge, %31, %32 : vector<16x128xi32>
    %c16_i32 = arith.constant 16 : i32
    %34 = vector.broadcast %c16_i32 : i32 to vector<16x128xi32>
    %35 = arith.cmpi slt, %31, %34 : vector<16x128xi32>
    %36 = arith.andi %33, %35 : vector<16x128xi1>
    %cst_17 = arith.constant 0.000000e+00 : f32
    %37 = vector.broadcast %cst_17 : f32 to vector<16x128xf32>
    %38 = arith.select %36, %29, %37 : vector<16x128xi1>, vector<16x128xf32>
    %c6_i32 = arith.constant 6 : i32
    %39 = tpu.dynamic_rotate %27 by %c6_i32 dim 0 : vector<16x128xf32>, i32 -> vector<16x128xf32>
    %c-6_i32 = arith.constant -6 : i32
    %40 = vector.broadcast %c-6_i32 : i32 to vector<16x128xi32>
    %41 = arith.addi %28, %40 : vector<16x128xi32>
    %c0_i32_18 = arith.constant 0 : i32
    %42 = vector.broadcast %c0_i32_18 : i32 to vector<16x128xi32>
    %43 = arith.cmpi sge, %41, %42 : vector<16x128xi32>
    %c16_i32_19 = arith.constant 16 : i32
    %44 = vector.broadcast %c16_i32_19 : i32 to vector<16x128xi32>
    %45 = arith.cmpi slt, %41, %44 : vector<16x128xi32>
    %46 = arith.andi %43, %45 : vector<16x128xi1>
    %cst_20 = arith.constant 0.000000e+00 : f32
    %47 = vector.broadcast %cst_20 : f32 to vector<16x128xf32>
    %48 = arith.select %46, %39, %47 : vector<16x128xi1>, vector<16x128xf32>
    %c5_i32 = arith.constant 5 : i32
    %49 = tpu.dynamic_rotate %27 by %c5_i32 dim 0 : vector<16x128xf32>, i32 -> vector<16x128xf32>
    %c-5_i32 = arith.constant -5 : i32
    %50 = vector.broadcast %c-5_i32 : i32 to vector<16x128xi32>
    %51 = arith.addi %28, %50 : vector<16x128xi32>
    %c0_i32_21 = arith.constant 0 : i32
    %52 = vector.broadcast %c0_i32_21 : i32 to vector<16x128xi32>
    %53 = arith.cmpi sge, %51, %52 : vector<16x128xi32>
    %c16_i32_22 = arith.constant 16 : i32
    %54 = vector.broadcast %c16_i32_22 : i32 to vector<16x128xi32>
    %55 = arith.cmpi slt, %51, %54 : vector<16x128xi32>
    %56 = arith.andi %53, %55 : vector<16x128xi1>
    %cst_23 = arith.constant 0.000000e+00 : f32
    %57 = vector.broadcast %cst_23 : f32 to vector<16x128xf32>
    %58 = arith.select %56, %49, %57 : vector<16x128xi1>, vector<16x128xf32>
    %c4_i32 = arith.constant 4 : i32
    %59 = tpu.dynamic_rotate %27 by %c4_i32 dim 0 : vector<16x128xf32>, i32 -> vector<16x128xf32>
    %c-4_i32 = arith.constant -4 : i32
    %60 = vector.broadcast %c-4_i32 : i32 to vector<16x128xi32>
    %61 = arith.addi %28, %60 : vector<16x128xi32>
    %c0_i32_24 = arith.constant 0 : i32
    %62 = vector.broadcast %c0_i32_24 : i32 to vector<16x128xi32>
    %63 = arith.cmpi sge, %61, %62 : vector<16x128xi32>
    %c16_i32_25 = arith.constant 16 : i32
    %64 = vector.broadcast %c16_i32_25 : i32 to vector<16x128xi32>
    %65 = arith.cmpi slt, %61, %64 : vector<16x128xi32>
    %66 = arith.andi %63, %65 : vector<16x128xi1>
    %cst_26 = arith.constant 0.000000e+00 : f32
    %67 = vector.broadcast %cst_26 : f32 to vector<16x128xf32>
    %68 = arith.select %66, %59, %67 : vector<16x128xi1>, vector<16x128xf32>
    %c3_i32 = arith.constant 3 : i32
    %69 = tpu.dynamic_rotate %27 by %c3_i32 dim 0 : vector<16x128xf32>, i32 -> vector<16x128xf32>
    %c-3_i32 = arith.constant -3 : i32
    %70 = vector.broadcast %c-3_i32 : i32 to vector<16x128xi32>
    %71 = arith.addi %28, %70 : vector<16x128xi32>
    %c0_i32_27 = arith.constant 0 : i32
    %72 = vector.broadcast %c0_i32_27 : i32 to vector<16x128xi32>
    %73 = arith.cmpi sge, %71, %72 : vector<16x128xi32>
    %c16_i32_28 = arith.constant 16 : i32
    %74 = vector.broadcast %c16_i32_28 : i32 to vector<16x128xi32>
    %75 = arith.cmpi slt, %71, %74 : vector<16x128xi32>
    %76 = arith.andi %73, %75 : vector<16x128xi1>
    %cst_29 = arith.constant 0.000000e+00 : f32
    %77 = vector.broadcast %cst_29 : f32 to vector<16x128xf32>
    %78 = arith.select %76, %69, %77 : vector<16x128xi1>, vector<16x128xf32>
    %c2_i32 = arith.constant 2 : i32
    %79 = tpu.dynamic_rotate %27 by %c2_i32 dim 0 : vector<16x128xf32>, i32 -> vector<16x128xf32>
    %c-2_i32 = arith.constant -2 : i32
    %80 = vector.broadcast %c-2_i32 : i32 to vector<16x128xi32>
    %81 = arith.addi %28, %80 : vector<16x128xi32>
    %c0_i32_30 = arith.constant 0 : i32
    %82 = vector.broadcast %c0_i32_30 : i32 to vector<16x128xi32>
    %83 = arith.cmpi sge, %81, %82 : vector<16x128xi32>
    %c16_i32_31 = arith.constant 16 : i32
    %84 = vector.broadcast %c16_i32_31 : i32 to vector<16x128xi32>
    %85 = arith.cmpi slt, %81, %84 : vector<16x128xi32>
    %86 = arith.andi %83, %85 : vector<16x128xi1>
    %cst_32 = arith.constant 0.000000e+00 : f32
    %87 = vector.broadcast %cst_32 : f32 to vector<16x128xf32>
    %88 = arith.select %86, %79, %87 : vector<16x128xi1>, vector<16x128xf32>
    %c1_i32 = arith.constant 1 : i32
    %89 = tpu.dynamic_rotate %27 by %c1_i32 dim 0 : vector<16x128xf32>, i32 -> vector<16x128xf32>
    %c-1_i32 = arith.constant -1 : i32
    %90 = vector.broadcast %c-1_i32 : i32 to vector<16x128xi32>
    %91 = arith.addi %28, %90 : vector<16x128xi32>
    %c0_i32_33 = arith.constant 0 : i32
    %92 = vector.broadcast %c0_i32_33 : i32 to vector<16x128xi32>
    %93 = arith.cmpi sge, %91, %92 : vector<16x128xi32>
    %c16_i32_34 = arith.constant 16 : i32
    %94 = vector.broadcast %c16_i32_34 : i32 to vector<16x128xi32>
    %95 = arith.cmpi slt, %91, %94 : vector<16x128xi32>
    %96 = arith.andi %93, %95 : vector<16x128xi1>
    %cst_35 = arith.constant 0.000000e+00 : f32
    %97 = vector.broadcast %cst_35 : f32 to vector<16x128xf32>
    %98 = arith.select %96, %89, %97 : vector<16x128xi1>, vector<16x128xf32>
    %c15_i32 = arith.constant 15 : i32
    %99 = tpu.dynamic_rotate %27 by %c15_i32 dim 0 : vector<16x128xf32>, i32 -> vector<16x128xf32>
    %c1_i32_36 = arith.constant 1 : i32
    %100 = vector.broadcast %c1_i32_36 : i32 to vector<16x128xi32>
    %101 = arith.addi %28, %100 : vector<16x128xi32>
    %c0_i32_37 = arith.constant 0 : i32
    %102 = vector.broadcast %c0_i32_37 : i32 to vector<16x128xi32>
    %103 = arith.cmpi sge, %101, %102 : vector<16x128xi32>
    %c16_i32_38 = arith.constant 16 : i32
    %104 = vector.broadcast %c16_i32_38 : i32 to vector<16x128xi32>
    %105 = arith.cmpi slt, %101, %104 : vector<16x128xi32>
    %106 = arith.andi %103, %105 : vector<16x128xi1>
    %cst_39 = arith.constant 0.000000e+00 : f32
    %107 = vector.broadcast %cst_39 : f32 to vector<16x128xf32>
    %108 = arith.select %106, %99, %107 : vector<16x128xi1>, vector<16x128xf32>
    %c14_i32 = arith.constant 14 : i32
    %109 = tpu.dynamic_rotate %27 by %c14_i32 dim 0 : vector<16x128xf32>, i32 -> vector<16x128xf32>
    %c2_i32_40 = arith.constant 2 : i32
    %110 = vector.broadcast %c2_i32_40 : i32 to vector<16x128xi32>
    %111 = arith.addi %28, %110 : vector<16x128xi32>
    %c0_i32_41 = arith.constant 0 : i32
    %112 = vector.broadcast %c0_i32_41 : i32 to vector<16x128xi32>
    %113 = arith.cmpi sge, %111, %112 : vector<16x128xi32>
    %c16_i32_42 = arith.constant 16 : i32
    %114 = vector.broadcast %c16_i32_42 : i32 to vector<16x128xi32>
    %115 = arith.cmpi slt, %111, %114 : vector<16x128xi32>
    %116 = arith.andi %113, %115 : vector<16x128xi1>
    %cst_43 = arith.constant 0.000000e+00 : f32
    %117 = vector.broadcast %cst_43 : f32 to vector<16x128xf32>
    %118 = arith.select %116, %109, %117 : vector<16x128xi1>, vector<16x128xf32>
    %c13_i32 = arith.constant 13 : i32
    %119 = tpu.dynamic_rotate %27 by %c13_i32 dim 0 : vector<16x128xf32>, i32 -> vector<16x128xf32>
    %c3_i32_44 = arith.constant 3 : i32
    %120 = vector.broadcast %c3_i32_44 : i32 to vector<16x128xi32>
    %121 = arith.addi %28, %120 : vector<16x128xi32>
    %c0_i32_45 = arith.constant 0 : i32
    %122 = vector.broadcast %c0_i32_45 : i32 to vector<16x128xi32>
    %123 = arith.cmpi sge, %121, %122 : vector<16x128xi32>
    %c16_i32_46 = arith.constant 16 : i32
    %124 = vector.broadcast %c16_i32_46 : i32 to vector<16x128xi32>
    %125 = arith.cmpi slt, %121, %124 : vector<16x128xi32>
    %126 = arith.andi %123, %125 : vector<16x128xi1>
    %cst_47 = arith.constant 0.000000e+00 : f32
    %127 = vector.broadcast %cst_47 : f32 to vector<16x128xf32>
    %128 = arith.select %126, %119, %127 : vector<16x128xi1>, vector<16x128xf32>
    %c12_i32 = arith.constant 12 : i32
    %129 = tpu.dynamic_rotate %27 by %c12_i32 dim 0 : vector<16x128xf32>, i32 -> vector<16x128xf32>
    %c4_i32_48 = arith.constant 4 : i32
    %130 = vector.broadcast %c4_i32_48 : i32 to vector<16x128xi32>
    %131 = arith.addi %28, %130 : vector<16x128xi32>
    %c0_i32_49 = arith.constant 0 : i32
    %132 = vector.broadcast %c0_i32_49 : i32 to vector<16x128xi32>
    %133 = arith.cmpi sge, %131, %132 : vector<16x128xi32>
    %c16_i32_50 = arith.constant 16 : i32
    %134 = vector.broadcast %c16_i32_50 : i32 to vector<16x128xi32>
    %135 = arith.cmpi slt, %131, %134 : vector<16x128xi32>
    %136 = arith.andi %133, %135 : vector<16x128xi1>
    %cst_51 = arith.constant 0.000000e+00 : f32
    %137 = vector.broadcast %cst_51 : f32 to vector<16x128xf32>
    %138 = arith.select %136, %129, %137 : vector<16x128xi1>, vector<16x128xf32>
    %c11_i32 = arith.constant 11 : i32
    %139 = tpu.dynamic_rotate %27 by %c11_i32 dim 0 : vector<16x128xf32>, i32 -> vector<16x128xf32>
    %c5_i32_52 = arith.constant 5 : i32
    %140 = vector.broadcast %c5_i32_52 : i32 to vector<16x128xi32>
    %141 = arith.addi %28, %140 : vector<16x128xi32>
    %c0_i32_53 = arith.constant 0 : i32
    %142 = vector.broadcast %c0_i32_53 : i32 to vector<16x128xi32>
    %143 = arith.cmpi sge, %141, %142 : vector<16x128xi32>
    %c16_i32_54 = arith.constant 16 : i32
    %144 = vector.broadcast %c16_i32_54 : i32 to vector<16x128xi32>
    %145 = arith.cmpi slt, %141, %144 : vector<16x128xi32>
    %146 = arith.andi %143, %145 : vector<16x128xi1>
    %cst_55 = arith.constant 0.000000e+00 : f32
    %147 = vector.broadcast %cst_55 : f32 to vector<16x128xf32>
    %148 = arith.select %146, %139, %147 : vector<16x128xi1>, vector<16x128xf32>
    %c10_i32 = arith.constant 10 : i32
    %149 = tpu.dynamic_rotate %27 by %c10_i32 dim 0 : vector<16x128xf32>, i32 -> vector<16x128xf32>
    %c6_i32_56 = arith.constant 6 : i32
    %150 = vector.broadcast %c6_i32_56 : i32 to vector<16x128xi32>
    %151 = arith.addi %28, %150 : vector<16x128xi32>
    %c0_i32_57 = arith.constant 0 : i32
    %152 = vector.broadcast %c0_i32_57 : i32 to vector<16x128xi32>
    %153 = arith.cmpi sge, %151, %152 : vector<16x128xi32>
    %c16_i32_58 = arith.constant 16 : i32
    %154 = vector.broadcast %c16_i32_58 : i32 to vector<16x128xi32>
    %155 = arith.cmpi slt, %151, %154 : vector<16x128xi32>
    %156 = arith.andi %153, %155 : vector<16x128xi1>
    %cst_59 = arith.constant 0.000000e+00 : f32
    %157 = vector.broadcast %cst_59 : f32 to vector<16x128xf32>
    %158 = arith.select %156, %149, %157 : vector<16x128xi1>, vector<16x128xf32>
    %c9_i32 = arith.constant 9 : i32
    %159 = tpu.dynamic_rotate %27 by %c9_i32 dim 0 : vector<16x128xf32>, i32 -> vector<16x128xf32>
    %c7_i32_60 = arith.constant 7 : i32
    %160 = vector.broadcast %c7_i32_60 : i32 to vector<16x128xi32>
    %161 = arith.addi %28, %160 : vector<16x128xi32>
    %c0_i32_61 = arith.constant 0 : i32
    %162 = vector.broadcast %c0_i32_61 : i32 to vector<16x128xi32>
    %163 = arith.cmpi sge, %161, %162 : vector<16x128xi32>
    %c16_i32_62 = arith.constant 16 : i32
    %164 = vector.broadcast %c16_i32_62 : i32 to vector<16x128xi32>
    %165 = arith.cmpi slt, %161, %164 : vector<16x128xi32>
    %166 = arith.andi %163, %165 : vector<16x128xi1>
    %cst_63 = arith.constant 0.000000e+00 : f32
    %167 = vector.broadcast %cst_63 : f32 to vector<16x128xf32>
    %168 = arith.select %166, %159, %167 : vector<16x128xi1>, vector<16x128xf32>
    %169 = tpu.concatenate %38, %48, %58, %68, %78, %88, %98, %27, %108, %118, %128, %138, %148, %158, %168 in 1 : vector<16x128xf32>, vector<16x128xf32>, vector<16x128xf32>, vector<16x128xf32>, vector<16x128xf32>, vector<16x128xf32>, vector<16x128xf32>, vector<16x128xf32>, vector<16x128xf32>, vector<16x128xf32>, vector<16x128xf32>, vector<16x128xf32>, vector<16x128xf32>, vector<16x128xf32>, vector<16x128xf32> -> vector<16x1920xf32>
    %c0_64 = arith.constant 0 : index
    %c0_65 = arith.constant 0 : index
    %170 = vector.load %arg3[%c0_64, %c0_65] : memref<1920x128xf32, #tpu.memory_space<vmem>>, vector<1920x128xf32>
    %cst_66 = arith.constant dense<0.000000e+00> : vector<16x128xf32>
    %171 = tpu.matmul %169, %170, %cst_66 {dimension_numbers = #tpu.dot_dimension_numbers<[1], [0], [0], [1], [0, 0, 1, 1], [], []>} : vector<16x1920xf32>, vector<1920x128xf32>, vector<16x128xf32> -> vector<16x128xf32>
    %cst_67 = arith.constant dense<0.000000e+00> : vector<128xf32>
    %172 = vector.multi_reduction <add>, %171, %cst_67 [0] : vector<16x128xf32> to vector<128xf32>
    %173 = vector.shape_cast %172 : vector<128xf32> to vector<1x128xf32>
    %174 = arith.mulf %171, %171 : vector<16x128xf32>
    %cst_68 = arith.constant dense<0.000000e+00> : vector<128xf32>
    %175 = vector.multi_reduction <add>, %174, %cst_68 [0] : vector<16x128xf32> to vector<128xf32>
    %176 = vector.shape_cast %175 : vector<128xf32> to vector<1x128xf32>
    %c0_69 = arith.constant 0 : index
    %c0_70 = arith.constant 0 : index
    %177 = vector.load %arg4[%c0_69, %c0_70] : memref<128x128xf32, #tpu.memory_space<vmem>>, vector<128x128xf32>
    %cst_71 = arith.constant dense<0.000000e+00> : vector<1x128xf32>
    %178 = tpu.matmul %173, %177, %cst_71 {dimension_numbers = #tpu.dot_dimension_numbers<[1], [0], [0], [1], [0, 0, 1, 1], [], []>} : vector<1x128xf32>, vector<128x128xf32>, vector<1x128xf32> -> vector<1x128xf32>
    %c0_72 = arith.constant 0 : index
    %c0_73 = arith.constant 0 : index
    %179 = vector.load %arg4[%c0_72, %c0_73] : memref<128x128xf32, #tpu.memory_space<vmem>>, vector<128x128xf32>
    %cst_74 = arith.constant dense<0.000000e+00> : vector<1x128xf32>
    %180 = tpu.matmul %176, %179, %cst_74 {dimension_numbers = #tpu.dot_dimension_numbers<[1], [0], [0], [1], [0, 0, 1, 1], [], []>} : vector<1x128xf32>, vector<128x128xf32>, vector<1x128xf32> -> vector<1x128xf32>
    %181 = arith.mulf %178, %178 : vector<1x128xf32>
    %182 = arith.subf %180, %181 : vector<1x128xf32>
    %c0_75 = arith.constant 0 : index
    %c0_76 = arith.constant 0 : index
    %183 = vector.load %arg7[%c0_75, %c0_76] : memref<1x128xf32, #tpu.memory_space<vmem>>, vector<1x128xf32>
    %cst_77 = arith.constant 9.99999974E-6 : f32
    %184 = vector.broadcast %cst_77 : f32 to vector<1x128xf32>
    %185 = arith.addf %182, %184 : vector<1x128xf32>
    %186 = math.rsqrt %185 : vector<1x128xf32>
    %187 = arith.mulf %183, %186 : vector<1x128xf32>
    %c0_78 = arith.constant 0 : index
    %c0_79 = arith.constant 0 : index
    %188 = vector.load %arg8[%c0_78, %c0_79] : memref<1x128xf32, #tpu.memory_space<vmem>>, vector<1x128xf32>
    %189 = arith.mulf %178, %187 : vector<1x128xf32>
    %190 = arith.subf %188, %189 : vector<1x128xf32>
    %191 = vector.broadcast %187 : vector<1x128xf32> to vector<16x128xf32>
    %192 = arith.mulf %171, %191 : vector<16x128xf32>
    %193 = vector.broadcast %190 : vector<1x128xf32> to vector<16x128xf32>
    %194 = arith.addf %192, %193 : vector<16x128xf32>
    %195 = arith.addf %194, %0 : vector<16x128xf32>
    %cst_80 = arith.constant 0.000000e+00 : f32
    %196 = vector.broadcast %cst_80 : f32 to vector<16x128xf32>
    %197 = arith.maximumf %195, %196 : vector<16x128xf32>
    %c0_81 = arith.constant 0 : index
    %c0_82 = arith.constant 0 : index
    %198 = vector.load %arg9[%c0_81, %c0_82] : memref<16x128xf32, #tpu.memory_space<vmem>>, vector<16x128xf32>
    tpu.vector_store %arg9[%c0_81, %c0_82], %197 {strides = array<i32>} : memref<16x128xf32, #tpu.memory_space<vmem>>, vector<16x128xf32>,
    return
  }
  func.func @transform_0(%arg0: i32) -> (i32, i32) {
    %c0_i32 = arith.constant 0 : i32
    %c0_i32_0 = arith.constant 0 : i32
    %c0_i32_1 = arith.constant 0 : i32
    return %c0_i32, %c0_i32_0 : i32, i32
  }
  func.func @transform_1(%arg0: i32) -> (i32, i32) {
    %c0_i32 = arith.constant 0 : i32
    %c0_i32_0 = arith.constant 0 : i32
    %c0_i32_1 = arith.constant 0 : i32
    return %c0_i32, %c0_i32_0 : i32, i32
  }
  func.func @transform_2(%arg0: i32) -> (i32, i32) {
    %c0_i32 = arith.constant 0 : i32
    %c0_i32_0 = arith.constant 0 : i32
    %c0_i32_1 = arith.constant 0 : i32
    return %c0_i32, %c0_i32_0 : i32, i32
  }
  func.func @transform_3(%arg0: i32) -> (i32, i32) {
    %c0_i32 = arith.constant 0 : i32
    %c0_i32_0 = arith.constant 0 : i32
    %c0_i32_1 = arith.constant 0 : i32
    return %c0_i32, %c0_i32_0 : i32, i32
  }
  func.func @transform_4(%arg0: i32) -> (i32, i32) {
    %c0_i32 = arith.constant 0 : i32
    %c0_i32_0 = arith.constant 0 : i32
    %c0_i32_1 = arith.constant 0 : i32
    return %c0_i32, %c0_i32_0 : i32, i32
  }
  func.func @transform_5(%arg0: i32) -> (i32, i32) {
    %c0_i32 = arith.constant 0 : i32
    %c0_i32_0 = arith.constant 0 : i32
    %c0_i32_1 = arith.constant 0 : i32
    return %c0_i32, %c0_i32_0 : i32, i32
  }
  func.func @transform_6(%arg0: i32) -> (i32, i32) {
    %c0_i32 = arith.constant 0 : i32
    %c0_i32_0 = arith.constant 0 : i32
    %c0_i32_1 = arith.constant 0 : i32
    return %c0_i32, %c0_i32_0 : i32, i32
  }
  func.func @transform_7(%arg0: i32) -> (i32, i32) {
    %c0_i32 = arith.constant 0 : i32
    %c0_i32_0 = arith.constant 0 : i32
    %c0_i32_1 = arith.constant 0 : i32
    return %c0_i32, %c0_i32_0 : i32, i32
  }
  func.func @transform_8(%arg0: i32) -> (i32, i32) {
    %c0_i32 = arith.constant 0 : i32
    %c0_i32_0 = arith.constant 0 : i32
    %c0_i32_1 = arith.constant 0 : i32
    return %c0_i32, %c0_i32_0 : i32, i32
  }
}

</mosaic_0001>

<bundles_post_ra>
// kernel: _basic_block_apply.1
= control target key start
LH: loop header
LB: loop body
LE: loop exit
PB: predicated region body
PF: predicated region fallthrough
CT: control target
= control target key end

     0   :  { %13 = vsyncpa [#allocation3], 0  ;;  %s2559_s27 = smov [#allocation2]   ;;  %s3019_s0 = inlined_call_operand.vmem [shape: f32[16,128], index: 0, kind: input, shape index: {}]   ;;  %s3020_s1 = inlined_call_operand.vmem [shape: f32[128,128], index: 1, kind: input, shape index: {}]   ;;  %s3021_s2 = inlined_call_operand.hbm [shape: f32[1920,128], index: 2, kind: input, shape index: {}]   ;;  %s3022_s3 = inlined_call_operand.vmem [shape: f32[128,128], index: 3, kind: input, shape index: {}]   ;;  %s3023_s4 = inlined_call_operand.vmem [shape: f32[1,128], index: 4, kind: input, shape index: {}]   ;;  %s3024_s5 = inlined_call_operand.vmem [shape: f32[1,128], index: 5, kind: input, shape index: {}]   ;;  %s3025_s6 = inlined_call_operand.vmem [shape: f32[1,128], index: 6, kind: input, shape index: {}]   ;;  %s3026_s7 = inlined_call_operand.vmem [shape: f32[1,128], index: 7, kind: input, shape index: {}]   ;;  %s3027_s8 = inlined_call_operand.vmem [shape: f32[16,128], index: 8, kind: output, shape index: {}]  }
   0x1   :  { %s23_s28 = sshll.u32 %s2559_s27, 4  ;;  %s2535_s9 = scalar_lea.hbm %s3021_s2, 30720  ;;  %s24_s28 = int_to_ptr.vmem [resolvable:$true] %s23_s28 }
   0x2   :  { %p2536_p0 = scmp.ne.s32.totalorder %s3021_s2, %s2535_s9  ;;  %p2539_p1 = scmp.lt.u32.totalorder %s2535_s9, %s3021_s2 }
   0x4   :  { %p2541_p2 = pnand %p2539_p1, %p2536_p0 }
   0x6   :  { %2544 = shalt.err (!%p2541_p2)
}
   0x7   :  { %s2545_s14 = scalar_lea.vmem %s24_s28, 30720  ;;  %p2550_p4 = scmp.lt.s32.totalorder %s24_s28, %s24_s28 }
   0x8   :  { %p2546_p3 = scmp.ne.s32.totalorder %s24_s28, %s2545_s14  ;;  %p2551_p5 = scmp.lt.s32.totalorder %s2545_s14, %s2545_s14 }
   0xa   :  { %p2552_p6 = por %p2551_p5, %p2550_p4 }
   0xc   :  { %p2553_p7 = pnand %p2552_p6, %p2546_p3 }
   0xe   :  { %2556 = shalt.err (!%p2553_p7)
}
   0xf   :  { %s2560_s15 = smov 128   ;;  %s2561_s16 = smov 8  }
  0x10   :  { %29 = dma.hbm_to_vmem [thread:$0]  %s3021_s2, 30720, %s24_s28, [#allocation3], %s2560_s15, %s2560_s15, %s2561_s16  }
  0x11   :  { %2557 = dma.done.wait [#allocation3], 30720  }
  0x12   :  { %2558 = vsyncadd [#allocation3], 4294936576  ;;  %v2562_v0 = vmov 0.0|0.0   ;;  %v45_v1 = vld [vmem:[%s3020_s1] sm:$0xff]  ;;  %v46_v2 = vld [vmem:[%s3020_s1 + $0x8] sm:$0xff]  ;;  %vm2563_vm0 = vmmov 0  }
  0x13   :  { %2171 = vmatprep.subr.bf16.mxu1 %v2562_v0  ;;  %v47_v3 = vld [vmem:[%s3020_s1 + $0x10] sm:$0xff]  ;;  %v2139_v4 = vpack.c.bf16 %v46_v2, %v45_v1  ;;  %v48_v5 = vld [vmem:[%s3020_s1 + $0x18] sm:$0xff]  ;;  %v49_v7 = vld [vmem:[%s3020_s1 + $0x20] sm:$0xff]  ;;  %v2564_v51 = vmov 0.0  }
  0x14   :  { %v2143_v6 = vpack.c.bf16 %v48_v5, %v47_v3  ;;  %v50_v8 = vld [vmem:[%s3020_s1 + $0x28] sm:$0xff]  ;;  %v51_v10 = vld [vmem:[%s3020_s1 + $0x30] sm:$0xff]  ;;  %v52_v11 = vld [vmem:[%s3020_s1 + $0x38] sm:$0xff]  ;;  %1996 = vmatprep.mubr.msk.f32.mxu1 %vm2563_vm0, %v2564_v51 }
  0x15   :  { %2140 = vmatprep.subr.bf16.mxu0 %v2139_v4  ;;  %v2147_v9 = vpack.c.bf16 %v50_v8, %v49_v7  ;;  %v43_v12 = vld [vmem:[%s3019_s0] sm:$0xff]  ;;  %v153_v14 = vld [vmem:[%s3022_s3 + $0x8] sm:$0xff]  ;;  %v154_v15 = vld [vmem:[%s3022_s3 + $0x10] sm:$0xff]  ;;  %v2151_v18 = vpack.c.bf16 %v52_v11, %v51_v10 }
  0x16   :  { %2142 = vmatpush3.bf16.msra.mxu0 %v2139_v4  ;;  %1961 = vmatprep.mubr.f32.mxu0 %v43_v12  ;;  %v152_v13 = vld [vmem:[%s3022_s3] sm:$0xff]  ;;  %v155_v17 = vld [vmem:[%s3022_s3 + $0x18] sm:$0xff]  ;;  %v54_v21 = vld [vmem:[%s3020_s1 + $0x48] sm:$0xff] }
  0x17   :  { %2144 = vmatprep.subr.bf16.mxu0 %v2143_v6  ;;  %v2659_v16 = vpack.c.bf16 %v153_v14, %v152_v13  ;;  %v53_v19 = vld [vmem:[%s3020_s1 + $0x40] sm:$0xff]  ;;  %v2668_v20 = vpack.c.bf16 %v155_v17, %v154_v15  ;;  %v157_v23 = vld [vmem:[%s3022_s3 + $0x28] sm:$0xff]  ;;  %v55_v25 = vld [vmem:[%s3020_s1 + $0x50] sm:$0xff] }
  0x18   :  { %v156_v22 = vld [vmem:[%s3022_s3 + $0x20] sm:$0xff]  ;;  %v2155_v24 = vpack.c.bf16 %v54_v21, %v53_v19  ;;  %v56_v27 = vld [vmem:[%s3020_s1 + $0x58] sm:$0xff]  ;;  %v158_v28 = vld [vmem:[%s3022_s3 + $0x30] sm:$0xff] }
  0x19   :  { %2173 = vmatpush3.bf16.msra.mxu1 %v2659_v16  ;;  %v2684_v26 = vpack.c.bf16 %v157_v23, %v156_v22  ;;  %v159_v29 = vld [vmem:[%s3022_s3 + $0x38] sm:$0xff]  ;;  %v2159_v30 = vpack.c.bf16 %v56_v27, %v55_v25  ;;  %v57_v32 = vld [vmem:[%s3020_s1 + $0x60] sm:$0xff]  ;;  %v58_v33 = vld [vmem:[%s3020_s1 + $0x68] sm:$0xff] }
  0x1a   :  { %2146 = vmatpush3.bf16.msra.mxu0 %v2143_v6  ;;  %2174 = vmatprep.subr.bf16.mxu1 %v2562_v0  ;;  %v2697_v31 = vpack.c.bf16 %v159_v29, %v158_v28  ;;  %v2163_v34 = vpack.c.bf16 %v58_v33, %v57_v32  ;;  %v59_v35 = vld [vmem:[%s3020_s1 + $0x70] sm:$0xff]  ;;  %v60_v36 = vld [vmem:[%s3020_s1 + $0x78] sm:$0xff]  ;;  %v44_v38 = vld [vmem:[%s3019_s0 + $0x8] sm:$0xff] }
  0x1b   :  { %2148 = vmatprep.subr.bf16.mxu0 %v2147_v9  ;;  %v2167_v37 = vpack.c.bf16 %v60_v36, %v59_v35  ;;  %v160_v39 = vld [vmem:[%s3022_s3 + $0x40] sm:$0xff]  ;;  %v161_v40 = vld [vmem:[%s3022_s3 + $0x48] sm:$0xff]  ;;  %v162_v42 = vld [vmem:[%s3022_s3 + $0x50] sm:$0xff] }
  0x1c   :  { %v2732_v41 = vpack.c.bf16 %v161_v40, %v160_v39  ;;  %v163_v43 = vld [vmem:[%s3022_s3 + $0x58] sm:$0xff]  ;;  %v164_v45 = vld [vmem:[%s3022_s3 + $0x60] sm:$0xff]  ;;  %v165_v46 = vld [vmem:[%s3022_s3 + $0x68] sm:$0xff] }
  0x1d   :  { %2176 = vmatpush3.bf16.msra.mxu1 %v2668_v20  ;;  %v2744_v44 = vpack.c.bf16 %v163_v43, %v162_v42  ;;  %v2756_v47 = vpack.c.bf16 %v165_v46, %v164_v45  ;;  %v166_v48 = vld [vmem:[%s3022_s3 + $0x70] sm:$0xff]  ;;  %v167_v49 = vld [vmem:[%s3022_s3 + $0x78] sm:$0xff]  ;;  %v529_v7 = vld [vmem:[#allocation2 + $0x80] sm:$0xff] }
  0x1e   :  { %2150 = vmatpush3.bf16.msra.mxu0 %v2147_v9  ;;  %2177 = vmatprep.subr.bf16.mxu1 %v2562_v0  ;;  %v2768_v50 = vpack.c.bf16 %v167_v49, %v166_v48  ;;  %v530_v8 = vld [vmem:[#allocation2 + $0x88] sm:$0xff]  ;;  %v561_v9 = vld [vmem:[#allocation2 + $0x180] sm:$0xff]  ;;  %v531_v21 = vld [vmem:[#allocation2 + $0x90] sm:$0xff] }
  0x1f   :  { %2152 = vmatprep.subr.bf16.mxu0 %v2151_v18  ;;  %v2219_v10 = vpack.c.bf16 %v530_v8, %v529_v7  ;;  %v562_v11 = vld [vmem:[#allocation2 + $0x188] sm:$0xff]  ;;  %v513_v12 = vld [vmem:[#allocation2] sm:$0xff]  ;;  %v532_v22 = vld [vmem:[#allocation2 + $0x98] sm:$0xff] }
  0x20   :  { %v514_v13 = vld [vmem:[#allocation2 + $0x8] sm:$0xff]  ;;  %v2251_v14 = vpack.c.bf16 %v562_v11, %v561_v9  ;;  %v545_v17 = vld [vmem:[#allocation2 + $0x100] sm:$0xff]  ;;  %v563_v23 = vld [vmem:[#allocation2 + $0x190] sm:$0xff] }
  0x21   :  { %2179 = vmatpush3.bf16.msra.mxu1 %v2684_v26  ;;  %v2221_v15 = vpack.c.bf16 %v514_v13, %v513_v12  ;;  %v564_v25 = vld [vmem:[#allocation2 + $0x198] sm:$0xff]  ;;  %v515_v27 = vld [vmem:[#allocation2 + $0x10] sm:$0xff]  ;;  %v533_v35 = vld [vmem:[#allocation2 + $0xa0] sm:$0xff] }
  0x22   :  { %2154 = vmatpush3.bf16.msra.mxu0 %v2151_v18  ;;  %2180 = vmatprep.subr.bf16.mxu1 %v2562_v0  ;;  %v546_v18 = vld [vmem:[#allocation2 + $0x108] sm:$0xff]  ;;  %v2255_v28 = vpack.c.bf16 %v564_v25, %v563_v23  ;;  %v516_v29 = vld [vmem:[#allocation2 + $0x18] sm:$0xff]  ;;  %v517_v40 = vld [vmem:[#allocation2 + $0x20] sm:$0xff] }
  0x23   :  { %2156 = vmatprep.subr.bf16.mxu0 %v2155_v24  ;;  %v2253_v19 = vpack.c.bf16 %v546_v18, %v545_v17  ;;  %v548_v32 = vld [vmem:[#allocation2 + $0x118] sm:$0xff]  ;;  %v2225_v33 = vpack.c.bf16 %v516_v29, %v515_v27  ;;  %v534_v36 = vld [vmem:[#allocation2 + $0xa8] sm:$0xff]  ;;  %v549_v46 = vld [vmem:[#allocation2 + $0x120] sm:$0xff] }
  0x24   :  { %v566_v39 = vld [vmem:[#allocation2 + $0x1a8] sm:$0xff]  ;;  %v521_v8 = vld [vmem:[#allocation2 + $0x40] sm:$0xff]  ;;  %v540_v17 = vld [vmem:[#allocation2 + $0xd8] sm:$0xff] }
  0x25   :  { %2182 = vmatpush3.bf16.msra.mxu1 %v2697_v31  ;;  %v518_v42 = vld [vmem:[#allocation2 + $0x28] sm:$0xff]  ;;  %v553_v12 = vld [vmem:[#allocation2 + $0x140] sm:$0xff]  ;;  %v555_v25 = vld [vmem:[#allocation2 + $0x150] sm:$0xff] }
  0x26   :  { %2158 = vmatpush3.bf16.msra.mxu0 %v2155_v24  ;;  %2183 = vmatprep.subr.bf16.mxu1 %v2562_v0  ;;  %v2223_v24 = vpack.c.bf16 %v532_v22, %v531_v21  ;;  %v2229_v45 = vpack.c.bf16 %v518_v42, %v517_v40  ;;  %v550_v48 = vld [vmem:[#allocation2 + $0x128] sm:$0xff]  ;;  %v572_v21 = vld [vmem:[#allocation2 + $0x1d8] sm:$0xff]  ;;  %v523_v22 = vld [vmem:[#allocation2 + $0x50] sm:$0xff] }
  0x27   :  { %2160 = vmatprep.subr.bf16.mxu0 %v2159_v30  ;;  %v2261_v49 = vpack.c.bf16 %v550_v48, %v549_v46  ;;  %v570_v7 = vld [vmem:[#allocation2 + $0x1c8] sm:$0xff]  ;;  %v556_v27 = vld [vmem:[#allocation2 + $0x158] sm:$0xff]  ;;  %v557_v40 = vld [vmem:[#allocation2 + $0x160] sm:$0xff] }
  0x28   :  { %v522_v9 = vld [vmem:[#allocation2 + $0x48] sm:$0xff]  ;;  %v2273_v29 = vpack.c.bf16 %v556_v27, %v555_v25  ;;  %v544_v46 = vld [vmem:[#allocation2 + $0xf8] sm:$0xff]  ;;  %v575_v48 = vld [vmem:[#allocation2 + $0x1f0] sm:$0xff] }
  0x29   :  { %2185 = vmatpush3.bf16.msra.mxu1 %v2732_v41  ;;  %v2237_v11 = vpack.c.bf16 %v522_v9, %v521_v8  ;;  %v554_v13 = vld [vmem:[#allocation2 + $0x148] sm:$0xff] }
  0x2a   :  { %2162 = vmatpush3.bf16.msra.mxu0 %v2159_v30  ;;  %2186 = vmatprep.subr.bf16.mxu1 %v2562_v0  ;;  %v547_v30 = vld [vmem:[#allocation2 + $0x110] sm:$0xff]  ;;  %v558_v42 = vld [vmem:[#allocation2 + $0x168] sm:$0xff] }
  0x2b   :  { %2164 = vmatprep.subr.bf16.mxu0 %v2163_v34 }
  0x2d   :  { %2188 = vmatpush3.bf16.msra.mxu1 %v2744_v44 }
  0x2e   :  { %2166 = vmatpush3.bf16.msra.mxu0 %v2163_v34  ;;  %2189 = vmatprep.subr.bf16.mxu1 %v2562_v0  ;;  %v2257_v34 = vpack.c.bf16 %v548_v32, %v547_v30  ;;  %v541_v30 = vld [vmem:[#allocation2 + $0xe0] sm:$0xff]  ;;  %v542_v32 = vld [vmem:[#allocation2 + $0xe8] sm:$0xff] }
  0x2f   :  { %2168 = vmatprep.subr.bf16.mxu0 %v2167_v37 }
  0x31   :  { %2191 = vmatpush3.bf16.msra.mxu1 %v2756_v47 }
  0x32   :  { %2170 = vmatpush3.bf16.msra.mxu0 %v2167_v37  ;;  %2192 = vmatprep.subr.bf16.mxu1 %v2562_v0  ;;  %v565_v37 = vld [vmem:[#allocation2 + $0x1a0] sm:$0xff] }
  0x33   :  { %2195 = vmatprep.subr.bf16.mxu0 %v2562_v0  ;;  %v2259_v43 = vpack.c.bf16 %v566_v39, %v565_v37  ;;  %v526_v37 = vld [vmem:[#allocation2 + $0x68] sm:$0xff] }
  0x35   :  { %1962 = vmatmul.mubr.f32.vlgmr.msra.gmra.mrb[0].mxu0 %v44_v38  ;;  %2194 = vmatpush3.bf16.msra.mxu1 %v2768_v50  ;;  %v2227_v38 = vpack.c.bf16 %v534_v36, %v533_v35  ;;  %v574_v35 = vld [vmem:[#allocation2 + $0x1e8] sm:$0xff]  ;;  %v525_v36 = vld [vmem:[#allocation2 + $0x60] sm:$0xff] }
  0x36   :  { %2197 = vmatpush3.bf16.msra.mxu0 %v2659_v16  ;;  %2031 = vmatprep.mubr.msk.f32.mxu0 %vm2563_vm0, %v2564_v51  ;;  %v2245_v39 = vpack.c.bf16 %v526_v37, %v525_v36  ;;  %v2809_v37 = vld [vmem:[#allocation2 + $0x290] sm:$0xff] }
  0x37   :  { %2198 = vmatprep.subr.bf16.mxu0 %v2562_v0  ;;  %2220 = vmatprep.subr.bf16.mxu1 %v2219_v10 }
  0x3a   :  { %2200 = vmatpush3.bf16.msra.mxu0 %v2668_v20 }
  0x3b   :  { %2201 = vmatprep.subr.bf16.mxu0 %v2562_v0 }
  0x3e   :  { %2203 = vmatpush3.bf16.msra.mxu0 %v2684_v26 }
  0x3f   :  { %2204 = vmatprep.subr.bf16.mxu0 %v2562_v0 }
  0x42   :  { %2206 = vmatpush3.bf16.msra.mxu0 %v2697_v31 }
  0x43   :  { %2207 = vmatprep.subr.bf16.mxu0 %v2562_v0 }
  0x46   :  { %2209 = vmatpush3.bf16.msra.mxu0 %v2732_v41 }
  0x47   :  { %2210 = vmatprep.subr.bf16.mxu0 %v2562_v0 }
  0x4a   :  { %2212 = vmatpush3.bf16.msra.mxu0 %v2744_v44 }
  0x4b   :  { %2213 = vmatprep.subr.bf16.mxu0 %v2562_v0 }
  0x4e   :  { %2215 = vmatpush3.bf16.msra.mxu0 %v2756_v47 }
  0x4f   :  { %2216 = vmatprep.subr.bf16.mxu0 %v2562_v0 }
  0x52   :  { %2218 = vmatpush3.bf16.msra.mxu0 %v2768_v50 }
  0x53   :  { %2252 = vmatprep.subr.bf16.mxu0 %v2251_v14  ;;  %v2269_v14 = vpack.c.bf16 %v554_v13, %v553_v12  ;;  %v318_v12 = vlaneseq }
  0x55   :  { %v2786_v13 = vshrl.u32 %v318_v12, 7  ;;  %v629_v12 = vld [vmem:[#allocation2 + $0x3a0] sm:$0xff] }
  0x57   :  { %vm355_vm1 = vcmp.lt.s32.totalorder %v2786_v13, 6  ;;  %vm385_vm3 = vcmp.lt.s32.totalorder %v2786_v13, 4  ;;  %vm340_vm5 = vcmp.lt.s32.totalorder %v2786_v13, 7  ;;  %vm370_vm6 = vcmp.lt.s32.totalorder %v2786_v13, 5 }
  0x58   :  { %vm415_vm9 = vcmp.lt.s32.totalorder %v2786_v13, 2  ;;  %vm400_vm10 = vcmp.lt.s32.totalorder %v2786_v13, 3  ;;  %vm430_vm11 = vcmp.lt.s32.totalorder %v2786_v13, 1 }
 0x108   :  { %v2776_v52 = vpop.f32.mrb[0].mxu0 }
 0x109   :  { %v144_v53 = vmul.f32 %v2776_v52, %v2776_v52  ;;  %v2780_v54 = vpop.f32.mrb[1].mxu0 }
 0x10a   :  { %v136_v55 = vadd.f32 %v2776_v52, %v2780_v54  ;;  %v143_v56 = vmul.f32 %v2780_v54, %v2780_v54 }
 0x10c   :  { %v137_v57 = vrot.slane %v136_v55, 4  ;;  %v145_v58 = vadd.f32 %v144_v53, %v143_v56  ;;  %v535_v53 = vld [vmem:[#allocation2 + $0xb0] sm:$0xff] }
 0x10d   :  { %v567_v56 = vld [vmem:[#allocation2 + $0x1b0] sm:$0xff] }
 0x10e   :  { %v138_v59 = vadd.f32 %v137_v57, %v136_v55  ;;  %v146_v60 = vrot.slane %v145_v58, 4  ;;  %v536_v55 = vld [vmem:[#allocation2 + $0xb8] sm:$0xff] }
 0x10f   :  { %v2231_v57 = vpack.c.bf16 %v536_v55, %v535_v53  ;;  %v576_v53 = vld [vmem:[#allocation2 + $0x1f8] sm:$0xff]  ;;  %v527_v55 = vld [vmem:[#allocation2 + $0x70] sm:$0xff] }
 0x110   :  { %v139_v61 = vrot.slane %v138_v59, 2  ;;  %v147_v62 = vadd.f32 %v146_v60, %v145_v58  ;;  %v568_v58 = vld [vmem:[#allocation2 + $0x1b8] sm:$0xff] }
 0x111   :  { %v520_v60 = vld [vmem:[#allocation2 + $0x38] sm:$0xff] }
 0x112   :  { %v148_v63 = vrot.slane %v147_v62, 2  ;;  %v140_v1 = vadd.f32 %v139_v61, %v138_v59  ;;  %v519_v59 = vld [vmem:[#allocation2 + $0x30] sm:$0xff]  ;;  %v2263_v61 = vpack.c.bf16 %v568_v58, %v567_v56  ;;  %v528_v56 = vld [vmem:[#allocation2 + $0x78] sm:$0xff] }
 0x113   :  { %v2249_v58 = vpack.c.bf16 %v528_v56, %v527_v55 }
 0x114   :  { %v141_v2 = vrot.slane %v140_v1, 1  ;;  %v149_v3 = vadd.f32 %v148_v63, %v147_v62  ;;  %v2233_v62 = vpack.c.bf16 %v520_v60, %v519_v59  ;;  %v551_v63 = vld [vmem:[#allocation2 + $0x130] sm:$0xff]  ;;  %v560_v60 = vld [vmem:[#allocation2 + $0x178] sm:$0xff] }
 0x115   :  { %v559_v59 = vld [vmem:[#allocation2 + $0x170] sm:$0xff] }
 0x116   :  { %v142_v4 = vadd.f32 %v141_v2, %v140_v1  ;;  %v150_v5 = vrot.slane %v149_v3, 1  ;;  %v552_v1 = vld [vmem:[#allocation2 + $0x138] sm:$0xff] }
 0x117   :  { %v2265_v2 = vpack.c.bf16 %v552_v1, %v551_v63  ;;  %v594_v63 = vld [vmem:[#allocation2 + $0x288] sm:$0xff]  ;;  %v625_v1 = vld [vmem:[#allocation2 + $0x380] sm:$0xff] }
 0x118   :  { %1997 = vmatmul.mubr.f32.vlgmr.msra.gmra.mrb[0].mxu1 %v142_v4  ;;  %v151_v6 = vadd.f32 %v150_v5, %v149_v3  ;;  %v537_v3 = vld [vmem:[#allocation2 + $0xc0] sm:$0xff]  ;;  %v538_v4 = vld [vmem:[#allocation2 + $0xc8] sm:$0xff] }
 0x119   :  { %2222 = vmatpush3.bf16.msra.mxu1 %v2221_v15  ;;  %v569_v5 = vld [vmem:[#allocation2 + $0x1c0] sm:$0xff]  ;;  %v539_v15 = vld [vmem:[#allocation2 + $0xd0] sm:$0xff] }
 0x11a   :  { %2032 = vmatmul.mubr.f32.vlgmr.msra.gmra.mrb[2].mxu0 %v151_v6  ;;  %2224 = vmatprep.subr.bf16.mxu1 %v2223_v24  ;;  %v2235_v6 = vpack.c.bf16 %v538_v4, %v537_v3  ;;  %v2267_v10 = vpack.c.bf16 %v570_v7, %v569_v5  ;;  %v2239_v18 = vpack.c.bf16 %v540_v17, %v539_v15  ;;  %v524_v24 = vld [vmem:[#allocation2 + $0x58] sm:$0xff]  ;;  %v626_v3 = vld [vmem:[#allocation2 + $0x388] sm:$0xff]  ;;  %v2792_v15 = vsub.s32 0, %v2786_v13 }
 0x11b   :  { %2254 = vmatpush3.bf16.msra.mxu0 %v2253_v19  ;;  %v571_v19 = vld [vmem:[#allocation2 + $0x1d0] sm:$0xff]  ;;  %v2315_v4 = vpack.c.bf16 %v626_v3, %v625_v1 }
 0x11c   :  { %2256 = vmatprep.subr.bf16.mxu0 %v2255_v28  ;;  %v2271_v23 = vpack.c.bf16 %v572_v21, %v571_v19  ;;  %v2241_v28 = vpack.c.bf16 %v524_v24, %v523_v22  ;;  %v314_v19 = vld [vmem:[%s3024_s5] sm:$0x1]  ;;  %v388_v24 = vadd.s32 4294967292, %v2786_v13 }
 0x11d   :  { %2226 = vmatpush3.bf16.msra.mxu1 %v2225_v33  ;;  %v573_v33 = vld [vmem:[#allocation2 + $0x1e0] sm:$0xff] }
 0x11e   :  { %2228 = vmatprep.subr.bf16.mxu1 %v2227_v38  ;;  %v2275_v38 = vpack.c.bf16 %v574_v35, %v573_v33  ;;  %v578_v33 = vld [vmem:[#allocation2 + $0x208] sm:$0xff]  ;;  %vm390_vm4 = vcmp.ge.s32.totalorder %v388_v24, 0 }
 0x11f   :  { %2258 = vmatpush3.bf16.msra.mxu0 %v2257_v34  ;;  %v2243_v34 = vpack.c.bf16 %v542_v32, %v541_v30  ;;  %v343_v30 = vadd.s32 4294967289, %v2786_v13  ;;  %v373_v32 = vadd.s32 4294967291, %v2786_v13  ;;  %v610_v35 = vld [vmem:[#allocation2 + $0x308] sm:$0xff] }
 0x120   :  { %2260 = vmatprep.subr.bf16.mxu0 %v2259_v43  ;;  %v2277_v43 = vpack.c.bf16 %v558_v42, %v557_v40 }
 0x121   :  { %2230 = vmatpush3.bf16.msra.mxu1 %v2229_v45  ;;  %v543_v45 = vld [vmem:[#allocation2 + $0xf0] sm:$0xff]  ;;  %vm345_vm7 = vcmp.ge.s32.totalorder %v343_v30, 0  ;;  %vm375_vm8 = vcmp.ge.s32.totalorder %v373_v32, 0  ;;  %v582_v30 = vld [vmem:[#allocation2 + $0x228] sm:$0xff] }
 0x122   :  { %2232 = vmatprep.subr.bf16.mxu1 %v2231_v57  ;;  %v2279_v57 = vpack.c.bf16 %v576_v53, %v575_v48  ;;  %v2824_v48 = vld [vmem:[#allocation2 + $0x310] sm:$0xff] }
 0x123   :  { %2262 = vmatpush3.bf16.msra.mxu0 %v2261_v49  ;;  %v2247_v49 = vpack.c.bf16 %v544_v46, %v543_v45  ;;  %v2822_v46 = vld [vmem:[#allocation2 + $0x218] sm:$0xff] }
 0x124   :  { %2264 = vmatprep.subr.bf16.mxu0 %v2263_v61  ;;  %v2281_v61 = vpack.c.bf16 %v560_v60, %v559_v59  ;;  %v2844_v60 = vadd.s32 4294967294, %v2786_v13 }
 0x125   :  { %2234 = vmatpush3.bf16.msra.mxu1 %v2233_v62  ;;  %v593_v62 = vld [vmem:[#allocation2 + $0x280] sm:$0xff] }
 0x126   :  { %2236 = vmatprep.subr.bf16.mxu1 %v2235_v6  ;;  %vm420_vm12 = vcmp.ge.s32.totalorder %v2844_v60, 0 }
 0x127   :  { %2266 = vmatpush3.bf16.msra.mxu0 %v2265_v2  ;;  %v2283_v2 = vpack.c.bf16 %v594_v63, %v593_v62 }
 0x128   :  { %2268 = vmatprep.subr.bf16.mxu0 %v2267_v10 }
 0x129   :  { %2238 = vmatpush3.bf16.msra.mxu1 %v2237_v11 }
 0x12a   :  { %2240 = vmatprep.subr.bf16.mxu1 %v2239_v18 }
 0x12b   :  { %2270 = vmatpush3.bf16.msra.mxu0 %v2269_v14  ;;  %v310_v14 = vld [vmem:[%s3023_s4] sm:$0x1] }
 0x12c   :  { %2272 = vmatprep.subr.bf16.mxu0 %v2271_v23  ;;  %v358_v23 = vadd.s32 4294967290, %v2786_v13 }
 0x12d   :  { %2242 = vmatpush3.bf16.msra.mxu1 %v2241_v28 }
 0x12e   :  { %2244 = vmatprep.subr.bf16.mxu1 %v2243_v34  ;;  %v609_v34 = vld [vmem:[#allocation2 + $0x300] sm:$0xff]  ;;  %vm360_vm2 = vcmp.ge.s32.totalorder %v358_v23, 0 }
 0x12f   :  { %2274 = vmatpush3.bf16.msra.mxu0 %v2273_v29  ;;  %v2802_v29 = vld [vmem:[#allocation2 + $0x200] sm:$0xff]  ;;  %v2317_v45 = vpack.c.bf16 %v610_v35, %v609_v34 }
 0x130   :  { %2276 = vmatprep.subr.bf16.mxu0 %v2275_v38  ;;  %v2817_v38 = vld [vmem:[#allocation2 + $0x398] sm:$0xff]  ;;  %v613_v35 = vld [vmem:[#allocation2 + $0x320] sm:$0xff] }
 0x131   :  { %2246 = vmatpush3.bf16.msra.mxu1 %v2245_v39  ;;  %v2819_v39 = vld [vmem:[#allocation2 + $0x210] sm:$0xff] }
 0x132   :  { %2248 = vmatprep.subr.bf16.mxu1 %v2247_v49  ;;  %v2826_v49 = vld [vmem:[#allocation2 + $0x318] sm:$0xff] }
 0x133   :  { %2278 = vmatpush3.bf16.msra.mxu0 %v2277_v43  ;;  %v2285_v43 = vpack.c.bf16 %v578_v33, %v2802_v29  ;;  %v2321_v59 = vpack.c.bf16 %v2826_v49, %v2824_v48  ;;  %v581_v29 = vld [vmem:[#allocation2 + $0x220] sm:$0xff]  ;;  %v583_v49 = vld [vmem:[#allocation2 + $0x230] sm:$0xff] }
 0x134   :  { %2280 = vmatprep.subr.bf16.mxu0 %v2279_v57 }
 0x135   :  { %2250 = vmatpush3.bf16.msra.mxu1 %v2249_v58  ;;  %v2289_v58 = vpack.c.bf16 %v2822_v46, %v2819_v39  ;;  %v631_v39 = vld [vmem:[#allocation2 + $0x3b0] sm:$0xff]  ;;  %v2293_v46 = vpack.c.bf16 %v582_v30, %v581_v29  ;;  %v588_v29 = vld [vmem:[#allocation2 + $0x258] sm:$0xff] }
 0x136   :  { %2284 = vmatprep.subr.bf16.mxu1 %v2283_v2 }
 0x137   :  { %2282 = vmatpush3.bf16.msra.mxu0 %v2281_v61 }
 0x138   :  { %2316 = vmatprep.subr.bf16.mxu0 %v2315_v4 }
 0x1eb   :  { %v234_v5 = vpop.f32.mrb[0].mxu1 }
 0x1ec   :  { %v308_v6 = vmul.f32 %v234_v5, %v234_v5  ;;  %v1998_v7 = vpop.f32.mrb[1].mxu1 }
 0x1ed   :  { %v304_v8 = vpop.f32.mrb[2].mxu0 }
 0x1ee   :  { %v309_v9 = vsub.f32 %v304_v8, %v308_v6  ;;  %v2033_v10 = vpop.f32.mrb[3].mxu0  ;;  %v597_v6 = vld [vmem:[#allocation2 + $0x2a0] sm:$0xff] }
 0x1f0   :  { %v311_v11 = vadd.f32 1e-05, %v309_v9 }
 0x1f2   :  { %2529 = vrsqrt.f32 %v311_v11  ;;  %v598_v11 = vld [vmem:[#allocation2 + $0x2a8] sm:$0xff] }
 0x1fc   :  { %v2530_v17 = vpop.eup %2529 }
 0x1fd   :  { %v313_v18 = vmul.f32 %v2530_v17, %v310_v14  ;;  %v630_v14 = vld [vmem:[#allocation2 + $0x3a8] sm:$0xff] }
 0x1ff   :  { %v315_v21 = vmul.f32 %v313_v18, %v234_v5  ;;  %v321_v22 = vrot.slane %v313_v18, %v2792_v15 }
 0x201   :  { %v316_v25 = vsub.f32 %v314_v19, %v315_v21  ;;  %v323_v27 = vmul.f32 %v321_v22, %v2780_v54  ;;  %v324_v28 = vmul.f32 %v2776_v52, %v321_v22  ;;  %v2811_v54 = vld [vmem:[#allocation2 + $0x298] sm:$0xff]  ;;  %v2815_v52 = vld [vmem:[#allocation2 + $0x390] sm:$0xff] }
 0x202   :  { %v2287_v53 = vpack.c.bf16 %v2811_v54, %v2809_v37  ;;  %v2319_v57 = vpack.c.bf16 %v2817_v38, %v2815_v52  ;;  %v599_v37 = vld [vmem:[#allocation2 + $0x2b0] sm:$0xff]  ;;  %v600_v38 = vld [vmem:[#allocation2 + $0x2b8] sm:$0xff] }
 0x203   :  { %v329_v36 = vrot.slane %v316_v25, %v2792_v15 }
 0x205   :  { %v331_v40 = vadd.f32 %v329_v36, %v323_v27  ;;  %v332_v42 = vadd.f32 %v329_v36, %v324_v28  ;;  %v2291_v27 = vpack.c.bf16 %v598_v11, %v597_v6  ;;  %v2323_v28 = vpack.c.bf16 %v630_v14, %v629_v12  ;;  %v614_v36 = vld [vmem:[#allocation2 + $0x328] sm:$0xff]  ;;  %v617_v11 = vld [vmem:[#allocation2 + $0x340] sm:$0xff]  ;;  %v603_v14 = vld [vmem:[#allocation2 + $0x2d0] sm:$0xff] }
 0x206   :  { %v2325_v48 = vpack.c.bf16 %v614_v36, %v613_v35  ;;  %v618_v12 = vld [vmem:[#allocation2 + $0x348] sm:$0xff]  ;;  %v620_v35 = vld [vmem:[#allocation2 + $0x358] sm:$0xff]  ;;  %v605_v36 = vld [vmem:[#allocation2 + $0x2e0] sm:$0xff] }
 0x207   :  { %v2831_v55 = vmax.f32 %v331_v40, 0.0  ;;  %v2833_v56 = vmax.f32 %v332_v42, 0.0  ;;  %v632_v40 = vld [vmem:[#allocation2 + $0x3b8] sm:$0xff] }
 0x208   :  { %v2327_v60 = vpack.c.bf16 %v632_v40, %v631_v39  ;;  %v638_v39 = vld [vmem:[#allocation2 + $0x3e8] sm:$0xff] }
 0x209   :  { %v353_v61 = vrot.slane %v2831_v55, 2  ;;  %v354_v62 = vrot.slane %v2833_v56, 2  ;;  %v383_v63 = vrot.slane %v2831_v55, 4  ;;  %v384_v1 = vrot.slane %v2833_v56, 4 }
 0x20a   :  { %v338_v2 = vrot.slane %v2831_v55, 1  ;;  %v339_v3 = vrot.slane %v2833_v56, 1  ;;  %v368_v4 = vrot.slane %v2831_v55, 3  ;;  %v369_v5 = vrot.slane %v2833_v56, 3 }
 0x20b   :  { %v2856_v7 = vsel %vm355_vm1, %v354_v62, %v353_v61  ;;  %v2860_v8 = vsel %vm385_vm3, %v384_v1, %v383_v63  ;;  %v2864_v9 = vsel %vm355_vm1, %v353_v61, %v354_v62  ;;  %v2868_v10 = vsel %vm385_vm3, %v383_v63, %v384_v1  ;;  %v615_v61 = vld [vmem:[#allocation2 + $0x330] sm:$0xff]  ;;  %v616_v62 = vld [vmem:[#allocation2 + $0x338] sm:$0xff]  ;;  %v601_v63 = vld [vmem:[#allocation2 + $0x2c0] sm:$0xff] }
 0x20c   :  { %1545 = vmatprep.mubr.msk.f32.mxu1 %vm360_vm2, %v2856_v7  ;;  %1547 = vmatprep.mubr.msk.f32.mxu0 %vm390_vm4, %v2860_v8  ;;  %v2876_v17 = vsel %vm340_vm5, %v339_v3, %v338_v2  ;;  %v2880_v18 = vsel %vm370_vm6, %v369_v5, %v368_v4  ;;  %v2884_v19 = vsel %vm340_vm5, %v338_v2, %v339_v3  ;;  %v413_v21 = vrot.slane %v2831_v55, 6  ;;  %v602_v1 = vld [vmem:[#allocation2 + $0x2c8] sm:$0xff]  ;;  %v633_v2 = vld [vmem:[#allocation2 + $0x3c0] sm:$0xff] }
 0x20d   :  { %1546 = vmatmul.mubr.msk.f32.vlgmr.msra.gmra.mrb[2].mxu1 %vm345_vm7, %v2876_v17  ;;  %1548 = vmatmul.mubr.msk.f32.vlgmr.msra.gmra.mrb[4].mxu0 %vm375_vm8, %v2880_v18  ;;  %v2893_v22 = vsel %vm370_vm6, %v368_v4, %v369_v5  ;;  %v414_v23 = vrot.slane %v2833_v56, 6  ;;  %v398_v24 = vrot.slane %v2831_v55, 5  ;;  %v399_v25 = vrot.slane %v2833_v56, 5  ;;  %v634_v3 = vld [vmem:[#allocation2 + $0x3c8] sm:$0xff]  ;;  %v585_v4 = vld [vmem:[#allocation2 + $0x240] sm:$0xff] }
 0x20e   :  { %2286 = vmatpush3.bf16.msra.mxu1 %v2285_v43  ;;  %2318 = vmatpush3.bf16.msra.mxu0 %v2317_v45  ;;  %v428_v33 = vrot.slane %v2831_v55, 7  ;;  %v429_v32 = vrot.slane %v2833_v56, 7  ;;  %v586_v5 = vld [vmem:[#allocation2 + $0x248] sm:$0xff]  ;;  %v2299_v6 = vpack.c.bf16 %v602_v1, %v601_v63  ;;  %v608_v63 = vld [vmem:[#allocation2 + $0x2f8] sm:$0xff]  ;;  %v639_v1 = vld [vmem:[#allocation2 + $0x3f0] sm:$0xff] }
 0x20f   :  { %822 = vmatprep.mubr.f32.mxu1 %v2864_v9  ;;  %897 = vmatprep.mubr.f32.mxu0 %v2868_v10  ;;  %v2904_v34 = vsel %vm415_vm9, %v414_v23, %v413_v21  ;;  %v2908_v54 = vsel %vm400_vm10, %v399_v25, %v398_v24  ;;  %v2912_v52 = vsel %vm415_vm9, %v413_v21, %v414_v23  ;;  %v604_v21 = vld [vmem:[#allocation2 + $0x2d8] sm:$0xff]  ;;  %v635_v23 = vld [vmem:[#allocation2 + $0x3d0] sm:$0xff] }
 0x210   :  { %2288 = vmatprep.subr.bf16.mxu1 %v2287_v53  ;;  %2320 = vmatprep.subr.bf16.mxu0 %v2319_v57  ;;  %v2917_v42 = vsel %vm430_vm11, %v429_v32, %v428_v33  ;;  %v2921_v43 = vsel %vm400_vm10, %v398_v24, %v399_v25  ;;  %v2925_v45 = vsel %vm430_vm11, %v428_v33, %v429_v32  ;;  %v584_v53 = vld [vmem:[#allocation2 + $0x238] sm:$0xff]  ;;  %v619_v32 = vld [vmem:[#allocation2 + $0x350] sm:$0xff] }
 0x211   :  { %823 = vmatmul.mubr.f32.gmra.mrb[4].mxu1 %v2884_v19  ;;  %898 = vmatmul.mubr.f32.gmra.mrb[6].mxu0 %v2893_v22  ;;  %v2295_v57 = vpack.c.bf16 %v600_v38, %v599_v37  ;;  %v636_v24 = vld [vmem:[#allocation2 + $0x3d8] sm:$0xff]  ;;  %v2301_v25 = vpack.c.bf16 %v586_v5, %v585_v4  ;;  %v2303_v30 = vpack.c.bf16 %v604_v21, %v603_v14  ;;  %v606_v37 = vld [vmem:[#allocation2 + $0x2e8] sm:$0xff]  ;;  %v637_v38 = vld [vmem:[#allocation2 + $0x3e0] sm:$0xff] }
 0x212   :  { %2290 = vmatpush3.bf16.msra.mxu1 %v2289_v58  ;;  %2322 = vmatpush3.bf16.msra.mxu0 %v2321_v59  ;;  %v2297_v58 = vpack.c.bf16 %v584_v53, %v583_v49  ;;  %v2329_v59 = vpack.c.bf16 %v616_v62, %v615_v61  ;;  %v2335_v33 = vpack.c.bf16 %v636_v24, %v635_v23  ;;  %v590_v49 = vld [vmem:[#allocation2 + $0x268] sm:$0xff]  ;;  %v607_v62 = vld [vmem:[#allocation2 + $0x2f0] sm:$0xff]  ;;  %v592_v4 = vld [vmem:[#allocation2 + $0x278] sm:$0xff] }
 0x213   :  { %1549 = vmatprep.mubr.msk.f32.mxu1 %vm420_vm12, %v2904_v34  ;;  %1042 = vmatprep.mubr.f32.mxu0 %v2831_v55  ;;  %v2331_v55 = vpack.c.bf16 %v634_v3, %v633_v2  ;;  %v2307_v53 = vpack.c.bf16 %v606_v37, %v605_v36  ;;  %v622_v61 = vld [vmem:[#allocation2 + $0x368] sm:$0xff]  ;;  %v640_v2 = vld [vmem:[#allocation2 + $0x3f8] sm:$0xff]  ;;  %v2311_v5 = vpack.c.bf16 %v608_v63, %v607_v62  ;;  %v689_v21 = vld [vmem:[#allocation2 + $0x580] sm:$0xff] }
 0x214   :  { %2292 = vmatprep.subr.bf16.mxu1 %v2291_v27  ;;  %2324 = vmatprep.subr.bf16.mxu0 %v2323_v28  ;;  %v2333_v27 = vpack.c.bf16 %v618_v12, %v617_v11  ;;  %v587_v28 = vld [vmem:[#allocation2 + $0x250] sm:$0xff]  ;;  %v624_v11 = vld [vmem:[#allocation2 + $0x378] sm:$0xff]  ;;  %v657_v12 = vld [vmem:[#allocation2 + $0x480] sm:$0xff] }
 0x215   :  { %v2305_v40 = vpack.c.bf16 %v588_v29, %v587_v28  ;;  %v658_v14 = vld [vmem:[#allocation2 + $0x488] sm:$0xff]  ;;  %v433_v28 = vadd.s32 4294967295, %v2786_v13  ;;  %v659_v37 = vld [vmem:[#allocation2 + $0x490] sm:$0xff]  ;;  %v676_v62 = vld [vmem:[#allocation2 + $0x518] sm:$0xff] }
 0x216   :  { %2294 = vmatpush3.bf16.msra.mxu1 %v2293_v46  ;;  %2326 = vmatpush3.bf16.msra.mxu0 %v2325_v48  ;;  %v2337_v46 = vpack.c.bf16 %v620_v35, %v619_v32  ;;  %v589_v48 = vld [vmem:[#allocation2 + $0x260] sm:$0xff]  ;;  %v690_v23 = vld [vmem:[#allocation2 + $0x588] sm:$0xff]  ;;  %v2347_v29 = vpack.c.bf16 %v658_v14, %v657_v12  ;;  %v663_v14 = vld [vmem:[#allocation2 + $0x4b0] sm:$0xff] }
 0x217   :  { %2296 = vmatprep.subr.bf16.mxu1 %v2295_v57  ;;  %2328 = vmatprep.subr.bf16.mxu0 %v2327_v60  ;;  %v2339_v57 = vpack.c.bf16 %v638_v39, %v637_v38  ;;  %v621_v60 = vld [vmem:[#allocation2 + $0x360] sm:$0xff]  ;;  %v2309_v3 = vpack.c.bf16 %v590_v49, %v589_v48  ;;  %v642_v32 = vld [vmem:[#allocation2 + $0x408] sm:$0xff]  ;;  %v660_v38 = vld [vmem:[#allocation2 + $0x498] sm:$0xff]  ;;  %vm435_vm14 = vcmp.ge.s32.totalorder %v433_v28, 0 }
 0x218   :  { %v673_v35 = vld [vmem:[#allocation2 + $0x500] sm:$0xff]  ;;  %v674_v36 = vld [vmem:[#allocation2 + $0x508] sm:$0xff]  ;;  %v691_v39 = vld [vmem:[#allocation2 + $0x590] sm:$0xff] }
 0x219   :  { %v2381_v48 = vpack.c.bf16 %v674_v36, %v673_v35  ;;  %v643_v49 = vld [vmem:[#allocation2 + $0x410] sm:$0xff]  ;;  %v661_v63 = vld [vmem:[#allocation2 + $0x4a0] sm:$0xff]  ;;  %v678_v12 = vld [vmem:[#allocation2 + $0x528] sm:$0xff] }
 0x21a   :  { %2298 = vmatpush3.bf16.msra.mxu1 %v2297_v58  ;;  %2330 = vmatpush3.bf16.msra.mxu0 %v2329_v59  ;;  %v2341_v58 = vpack.c.bf16 %v622_v61, %v621_v60  ;;  %v591_v59 = vld [vmem:[#allocation2 + $0x270] sm:$0xff]  ;;  %v648_v28 = vld [vmem:[#allocation2 + $0x438] sm:$0xff]  ;;  %v665_v35 = vld [vmem:[#allocation2 + $0x4c0] sm:$0xff] }
 0x21b   :  { %2300 = vmatprep.subr.bf16.mxu1 %v2299_v6  ;;  %2332 = vmatprep.subr.bf16.mxu0 %v2331_v55  ;;  %v2343_v6 = vpack.c.bf16 %v640_v2, %v639_v1  ;;  %v623_v55 = vld [vmem:[#allocation2 + $0x370] sm:$0xff]  ;;  %v2313_v24 = vpack.c.bf16 %v592_v4, %v591_v59  ;;  %v662_v1 = vld [vmem:[#allocation2 + $0x4a8] sm:$0xff]  ;;  %v693_v2 = vld [vmem:[#allocation2 + $0x5a0] sm:$0xff] }
 0x21c   :  { %v675_v61 = vld [vmem:[#allocation2 + $0x510] sm:$0xff]  ;;  %v645_v4 = vld [vmem:[#allocation2 + $0x420] sm:$0xff]  ;;  %v666_v36 = vld [vmem:[#allocation2 + $0x4c8] sm:$0xff] }
 0x21d   :  { %v2385_v59 = vpack.c.bf16 %v676_v62, %v675_v61  ;;  %v699_v61 = vld [vmem:[#allocation2 + $0x5d0] sm:$0xff]  ;;  %v700_v62 = vld [vmem:[#allocation2 + $0x5d8] sm:$0xff] }
 0x21e   :  { %2302 = vmatpush3.bf16.msra.mxu1 %v2301_v25  ;;  %2334 = vmatpush3.bf16.msra.mxu0 %v2333_v27  ;;  %v2345_v25 = vpack.c.bf16 %v624_v11, %v623_v55  ;;  %v403_v27 = vadd.s32 4294967293, %v2786_v13  ;;  %v677_v11 = vld [vmem:[#allocation2 + $0x520] sm:$0xff] }
 0x21f   :  { %2304 = vmatprep.subr.bf16.mxu1 %v2303_v30  ;;  %2336 = vmatprep.subr.bf16.mxu0 %v2335_v33  ;;  %v2379_v30 = vpack.c.bf16 %v690_v23, %v689_v21  ;;  %v641_v33 = vld [vmem:[#allocation2 + $0x400] sm:$0xff]  ;;  %v664_v21 = vld [vmem:[#allocation2 + $0x4b8] sm:$0xff]  ;;  %v695_v23 = vld [vmem:[#allocation2 + $0x5b0] sm:$0xff] }
 0x220   :  { %vm405_vm13 = vcmp.ge.s32.totalorder %v403_v27, 0  ;;  %v647_v27 = vld [vmem:[#allocation2 + $0x430] sm:$0xff] }
 0x222   :  { %2306 = vmatpush3.bf16.msra.mxu1 %v2305_v40  ;;  %2338 = vmatpush3.bf16.msra.mxu0 %v2337_v46  ;;  %v692_v40 = vld [vmem:[#allocation2 + $0x598] sm:$0xff]  ;;  %v2349_v46 = vpack.c.bf16 %v642_v32, %v641_v33  ;;  %v679_v33 = vld [vmem:[#allocation2 + $0x530] sm:$0xff] }
 0x223   :  { %2308 = vmatprep.subr.bf16.mxu1 %v2307_v53  ;;  %2340 = vmatprep.subr.bf16.mxu0 %v2339_v57  ;;  %v644_v53 = vld [vmem:[#allocation2 + $0x418] sm:$0xff]  ;;  %v2351_v57 = vpack.c.bf16 %v660_v38, %v659_v37  ;;  %v2383_v60 = vpack.c.bf16 %v692_v40, %v691_v39  ;;  %v697_v37 = vld [vmem:[#allocation2 + $0x5c0] sm:$0xff]  ;;  %v698_v38 = vld [vmem:[#allocation2 + $0x5c8] sm:$0xff] }
 0x224   :  { %v680_v32 = vld [vmem:[#allocation2 + $0x538] sm:$0xff]  ;;  %v649_v39 = vld [vmem:[#allocation2 + $0x440] sm:$0xff]  ;;  %v650_v40 = vld [vmem:[#allocation2 + $0x448] sm:$0xff] }
 0x226   :  { %2310 = vmatpush3.bf16.msra.mxu1 %v2309_v3  ;;  %2342 = vmatpush3.bf16.msra.mxu0 %v2341_v58  ;;  %v694_v3 = vld [vmem:[#allocation2 + $0x5a8] sm:$0xff]  ;;  %v2353_v58 = vpack.c.bf16 %v644_v53, %v643_v49  ;;  %v681_v49 = vld [vmem:[#allocation2 + $0x540] sm:$0xff] }
 0x227   :  { %2312 = vmatprep.subr.bf16.mxu1 %v2311_v5  ;;  %2344 = vmatprep.subr.bf16.mxu0 %v2343_v6  ;;  %v646_v5 = vld [vmem:[#allocation2 + $0x428] sm:$0xff]  ;;  %v2355_v6 = vpack.c.bf16 %v662_v1, %v661_v63  ;;  %v2387_v55 = vpack.c.bf16 %v694_v3, %v693_v2  ;;  %v2365_v63 = vpack.c.bf16 %v650_v40, %v649_v39  ;;  %v651_v2 = vld [vmem:[#allocation2 + $0x450] sm:$0xff]  ;;  %v652_v3 = vld [vmem:[#allocation2 + $0x458] sm:$0xff] }
 0x228   :  { %v682_v53 = vld [vmem:[#allocation2 + $0x548] sm:$0xff]  ;;  %v687_v39 = vld [vmem:[#allocation2 + $0x570] sm:$0xff]  ;;  %v688_v40 = vld [vmem:[#allocation2 + $0x578] sm:$0xff] }
 0x229   :  { %v2397_v1 = vpack.c.bf16 %v682_v53, %v681_v49  ;;  %v722_v49 = vld [vmem:[#allocation2 + $0x688] sm:$0xff]  ;;  %v737_v53 = vld [vmem:[#allocation2 + $0x700] sm:$0xff] }
 0x22a   :  { %2314 = vmatpush3.bf16.msra.mxu1 %v2313_v24  ;;  %2346 = vmatpush3.bf16.msra.mxu0 %v2345_v25  ;;  %v2357_v24 = vpack.c.bf16 %v646_v5, %v645_v4  ;;  %v2389_v25 = vpack.c.bf16 %v678_v12, %v677_v11  ;;  %v683_v4 = vld [vmem:[#allocation2 + $0x550] sm:$0xff]  ;;  %v684_v5 = vld [vmem:[#allocation2 + $0x558] sm:$0xff]  ;;  %v701_v11 = vld [vmem:[#allocation2 + $0x5e0] sm:$0xff] }
 0x22b   :  { %2348 = vmatprep.subr.bf16.mxu1 %v2347_v29  ;;  %2380 = vmatprep.subr.bf16.mxu0 %v2379_v30  ;;  %v2359_v29 = vpack.c.bf16 %v664_v21, %v663_v14  ;;  %v702_v12 = vld [vmem:[#allocation2 + $0x5e8] sm:$0xff]  ;;  %v2369_v14 = vpack.c.bf16 %v652_v3, %v651_v2  ;;  %v2401_v21 = vpack.c.bf16 %v684_v5, %v683_v4  ;;  %v705_v3 = vld [vmem:[#allocation2 + $0x600] sm:$0xff]  ;;  %v739_v4 = vld [vmem:[#allocation2 + $0x710] sm:$0xff] }
 0x22c   :  { %v740_v5 = vld [vmem:[#allocation2 + $0x718] sm:$0xff] }
 0x22d   :  { %1550 = vmatmul.mubr.msk.f32.vlgmr.msra.gmra.mrb[6].mxu1 %vm405_vm13, %v2908_v54  ;;  %1551 = vmatmul.mubr.msk.f32.vlgmr.msra.gmra.mrb[8].mxu0 %vm435_vm14, %v2917_v42 }
 0x22e   :  { %972 = vmatprep.mubr.f32.mxu1 %v2912_v52  ;;  %1047 = vmatprep.mubr.f32.mxu0 %v2833_v56  ;;  %v696_v56 = vld [vmem:[#allocation2 + $0x5b8] sm:$0xff] }
 0x22f   :  { %2350 = vmatpush3.bf16.msra.mxu1 %v2349_v46  ;;  %2382 = vmatpush3.bf16.msra.mxu0 %v2381_v48  ;;  %v2391_v30 = vpack.c.bf16 %v696_v56, %v695_v23  ;;  %v2363_v46 = vpack.c.bf16 %v666_v36, %v665_v35  ;;  %v2395_v48 = vpack.c.bf16 %v698_v38, %v697_v37  ;;  %v653_v23 = vld [vmem:[#allocation2 + $0x460] sm:$0xff]  ;;  %v654_v56 = vld [vmem:[#allocation2 + $0x468] sm:$0xff]  ;;  %v655_v37 = vld [vmem:[#allocation2 + $0x470] sm:$0xff] }
 0x230   :  { %2352 = vmatprep.subr.bf16.mxu1 %v2351_v57  ;;  %2384 = vmatprep.subr.bf16.mxu0 %v2383_v60  ;;  %v667_v57 = vld [vmem:[#allocation2 + $0x4d0] sm:$0xff]  ;;  %v668_v60 = vld [vmem:[#allocation2 + $0x4d8] sm:$0xff]  ;;  %v2373_v35 = vpack.c.bf16 %v654_v56, %v653_v23  ;;  %v725_v56 = vld [vmem:[#allocation2 + $0x6a0] sm:$0xff] }
 0x231   :  { %973 = vmatmul.mubr.f32.gmra.mrb[8].mxu1 %v2921_v43  ;;  %1048 = vmatmul.mubr.f32.gmra.mrb[10].mxu0 %v2925_v45  ;;  %v656_v38 = vld [vmem:[#allocation2 + $0x478] sm:$0xff] }
 0x232   :  { %1117 = vmatprep.mubr.f32.mxu1 %v2864_v9  ;;  %1192 = vmatprep.mubr.f32.mxu0 %v2868_v10  ;;  %v2361_v9 = vpack.c.bf16 %v648_v28, %v647_v27  ;;  %v2393_v10 = vpack.c.bf16 %v680_v32, %v679_v33  ;;  %v685_v27 = vld [vmem:[#allocation2 + $0x560] sm:$0xff]  ;;  %v686_v28 = vld [vmem:[#allocation2 + $0x568] sm:$0xff]  ;;  %v703_v33 = vld [vmem:[#allocation2 + $0x5f0] sm:$0xff] }
 0x233   :  { %2354 = vmatpush3.bf16.msra.mxu1 %v2353_v58  ;;  %2386 = vmatpush3.bf16.msra.mxu0 %v2385_v59  ;;  %v2367_v58 = vpack.c.bf16 %v668_v60, %v667_v57  ;;  %v2399_v59 = vpack.c.bf16 %v700_v62, %v699_v61  ;;  %v704_v32 = vld [vmem:[#allocation2 + $0x5f8] sm:$0xff]  ;;  %v2405_v36 = vpack.c.bf16 %v686_v28, %v685_v27  ;;  %v738_v57 = vld [vmem:[#allocation2 + $0x708] sm:$0xff] }
 0x234   :  { %2356 = vmatprep.subr.bf16.mxu1 %v2355_v6  ;;  %2388 = vmatprep.subr.bf16.mxu0 %v2387_v55  ;;  %v669_v6 = vld [vmem:[#allocation2 + $0x4e0] sm:$0xff]  ;;  %v670_v55 = vld [vmem:[#allocation2 + $0x4e8] sm:$0xff]  ;;  %v2377_v60 = vpack.c.bf16 %v656_v38, %v655_v37  ;;  %v2409_v61 = vpack.c.bf16 %v688_v40, %v687_v39  ;;  %v708_v23 = vld [vmem:[#allocation2 + $0x618] sm:$0xff] }
 0x235   :  { %v742_v27 = vld [vmem:[#allocation2 + $0x728] sm:$0xff]  ;;  %v711_v38 = vld [vmem:[#allocation2 + $0x630] sm:$0xff]  ;;  %v745_v39 = vld [vmem:[#allocation2 + $0x740] sm:$0xff] }
 0x237   :  { %2358 = vmatpush3.bf16.msra.mxu1 %v2357_v24  ;;  %2390 = vmatpush3.bf16.msra.mxu0 %v2389_v25  ;;  %v2371_v24 = vpack.c.bf16 %v670_v55, %v669_v6  ;;  %v2403_v25 = vpack.c.bf16 %v702_v12, %v701_v11 }
 0x238   :  { %2360 = vmatprep.subr.bf16.mxu1 %v2359_v29  ;;  %2392 = vmatprep.subr.bf16.mxu0 %v2391_v30  ;;  %v671_v29 = vld [vmem:[#allocation2 + $0x4f0] sm:$0xff]  ;;  %v672_v30 = vld [vmem:[#allocation2 + $0x4f8] sm:$0xff] }
 0x23b   :  { %2362 = vmatpush3.bf16.msra.mxu1 %v2361_v9  ;;  %2394 = vmatpush3.bf16.msra.mxu0 %v2393_v10  ;;  %v2375_v9 = vpack.c.bf16 %v672_v30, %v671_v29  ;;  %v2407_v10 = vpack.c.bf16 %v704_v32, %v703_v33  ;;  %v709_v33 = vld [vmem:[#allocation2 + $0x620] sm:$0xff]  ;;  %v727_v32 = vld [vmem:[#allocation2 + $0x6b0] sm:$0xff] }
 0x23c   :  { %2364 = vmatprep.subr.bf16.mxu1 %v2363_v46  ;;  %2396 = vmatprep.subr.bf16.mxu0 %v2395_v48  ;;  %v721_v46 = vld [vmem:[#allocation2 + $0x680] sm:$0xff]  ;;  %v2942_v48 = vadd.s32 8, %v2786_v13  ;;  %v724_v13 = vld [vmem:[#allocation2 + $0x698] sm:$0xff] }
 0x23d   :  { %v2411_v62 = vpack.c.bf16 %v722_v49, %v721_v46  ;;  %v713_v46 = vld [vmem:[#allocation2 + $0x640] sm:$0xff]  ;;  %v714_v49 = vld [vmem:[#allocation2 + $0x648] sm:$0xff] }
 0x23e   :  { %v474_v2 = vadd.s32 4, %v2942_v48  ;;  %v444_v6 = vadd.s32 1, %v2942_v48  ;;  %v464_v55 = vadd.s32 3, %v2942_v48 }
 0x23f   :  { %2366 = vmatpush3.bf16.msra.mxu1 %v2365_v63  ;;  %2398 = vmatpush3.bf16.msra.mxu0 %v2397_v1  ;;  %v2443_v63 = vpack.c.bf16 %v738_v57, %v737_v53  ;;  %v454_v1 = vadd.s32 2, %v2942_v48  ;;  %v731_v53 = vld [vmem:[#allocation2 + $0x6d0] sm:$0xff]  ;;  %v732_v57 = vld [vmem:[#allocation2 + $0x6d8] sm:$0xff] }
 0x240   :  { %2368 = vmatprep.subr.bf16.mxu1 %v2367_v58  ;;  %2400 = vmatprep.subr.bf16.mxu0 %v2399_v59  ;;  %v706_v58 = vld [vmem:[#allocation2 + $0x608] sm:$0xff]  ;;  %v723_v59 = vld [vmem:[#allocation2 + $0x690] sm:$0xff]  ;;  %vm478_vm1 = vcmp.lt.s32.totalorder %v474_v2, 16  ;;  %vm448_vm2 = vcmp.lt.s32.totalorder %v444_v6, 16  ;;  %vm468_vm3 = vcmp.lt.s32.totalorder %v464_v55, 16 }
 0x241   :  { %vm458_vm15 = vcmp.lt.s32.totalorder %v454_v1, 16  ;;  %v2413_v11 = vpack.c.bf16 %v706_v58, %v705_v3  ;;  %v2415_v12 = vpack.c.bf16 %v724_v13, %v723_v59  ;;  %v715_v2 = vld [vmem:[#allocation2 + $0x650] sm:$0xff]  ;;  %v716_v3 = vld [vmem:[#allocation2 + $0x658] sm:$0xff]  ;;  %v733_v58 = vld [vmem:[#allocation2 + $0x6e0] sm:$0xff] }
 0x242   :  { %v734_v59 = vld [vmem:[#allocation2 + $0x6e8] sm:$0xff]  ;;  %v749_v13 = vld [vmem:[#allocation2 + $0x760] sm:$0xff] }
 0x243   :  { %2370 = vmatpush3.bf16.msra.mxu1 %v2369_v14  ;;  %2402 = vmatpush3.bf16.msra.mxu0 %v2401_v21  ;;  %v2447_v14 = vpack.c.bf16 %v740_v5, %v739_v4  ;;  %v707_v21 = vld [vmem:[#allocation2 + $0x610] sm:$0xff]  ;;  %v750_v4 = vld [vmem:[#allocation2 + $0x768] sm:$0xff]  ;;  %v2433_v5 = vpack.c.bf16 %v716_v3, %v715_v2  ;;  %v2435_v6 = vpack.c.bf16 %v734_v59, %v733_v58 }
 0x244   :  { %2372 = vmatprep.subr.bf16.mxu1 %v2371_v24  ;;  %2404 = vmatprep.subr.bf16.mxu0 %v2403_v25  ;;  %v726_v24 = vld [vmem:[#allocation2 + $0x6a8] sm:$0xff]  ;;  %v741_v25 = vld [vmem:[#allocation2 + $0x720] sm:$0xff]  ;;  %v2417_v28 = vpack.c.bf16 %v708_v23, %v707_v21  ;;  %v2467_v55 = vpack.c.bf16 %v750_v4, %v749_v13  ;;  %v736_v21 = vld [vmem:[#allocation2 + $0x6f8] sm:$0xff] }
 0x245   :  { %v2419_v29 = vpack.c.bf16 %v726_v24, %v725_v56  ;;  %v2451_v30 = vpack.c.bf16 %v742_v27, %v741_v25  ;;  %v751_v23 = vld [vmem:[#allocation2 + $0x770] sm:$0xff]  ;;  %v752_v56 = vld [vmem:[#allocation2 + $0x778] sm:$0xff] }
 0x246   :  { %v2471_v27 = vpack.c.bf16 %v752_v56, %v751_v23 }
 0x247   :  { %2374 = vmatpush3.bf16.msra.mxu1 %v2373_v35  ;;  %2406 = vmatpush3.bf16.msra.mxu0 %v2405_v36  ;;  %v744_v35 = vld [vmem:[#allocation2 + $0x738] sm:$0xff] }
 0x248   :  { %2376 = vmatprep.subr.bf16.mxu1 %v2375_v9  ;;  %2408 = vmatprep.subr.bf16.mxu0 %v2407_v10  ;;  %v712_v9 = vld [vmem:[#allocation2 + $0x638] sm:$0xff]  ;;  %v729_v10 = vld [vmem:[#allocation2 + $0x6c0] sm:$0xff] }
 0x249   :  { %v2425_v40 = vpack.c.bf16 %v712_v9, %v711_v38 }
 0x24b   :  { %2378 = vmatpush3.bf16.msra.mxu1 %v2377_v60  ;;  %2410 = vmatpush3.bf16.msra.mxu0 %v2409_v61  ;;  %v747_v60 = vld [vmem:[#allocation2 + $0x750] sm:$0xff]  ;;  %v748_v61 = vld [vmem:[#allocation2 + $0x758] sm:$0xff] }
 0x24c   :  { %2412 = vmatprep.subr.bf16.mxu1 %v2411_v62  ;;  %2444 = vmatprep.subr.bf16.mxu0 %v2443_v63  ;;  %v2429_v62 = vpack.c.bf16 %v714_v49, %v713_v46  ;;  %v2463_v1 = vpack.c.bf16 %v748_v61, %v747_v60 }
 0x24e   :  { %1118 = vmatmul.mubr.f32.vlgmr.msra.gmra.mrb[10].mxu1 %v2884_v19  ;;  %1193 = vmatmul.mubr.f32.vlgmr.msra.gmra.mrb[12].mxu0 %v2893_v22  ;;  %v710_v19 = vld [vmem:[#allocation2 + $0x628] sm:$0xff]  ;;  %v728_v22 = vld [vmem:[#allocation2 + $0x6b8] sm:$0xff] }
 0x24f   :  { %1552 = vmatprep.mubr.msk.f32.mxu1 %vm458_vm15, %v2856_v7  ;;  %1554 = vmatprep.mubr.msk.f32.mxu0 %vm478_vm1, %v2860_v8  ;;  %v743_v7 = vld [vmem:[#allocation2 + $0x730] sm:$0xff]  ;;  %v2421_v8 = vpack.c.bf16 %v710_v19, %v709_v33  ;;  %v2423_v36 = vpack.c.bf16 %v728_v22, %v727_v32  ;;  %v504_v33 = vadd.s32 7, %v2942_v48  ;;  %v494_v19 = vadd.s32 6, %v2942_v48 }
 0x250   :  { %2414 = vmatpush3.bf16.msra.mxu1 %v2413_v11  ;;  %2446 = vmatpush3.bf16.msra.mxu0 %v2443_v63  ;;  %v2455_v37 = vpack.c.bf16 %v744_v35, %v743_v7  ;;  %v2431_v63 = vpack.c.bf16 %v732_v57, %v731_v53  ;;  %v717_v11 = vld [vmem:[#allocation2 + $0x660] sm:$0xff]  ;;  %v484_v32 = vadd.s32 5, %v2942_v48 }
 0x251   :  { %2416 = vmatprep.subr.bf16.mxu1 %v2415_v12  ;;  %2448 = vmatprep.subr.bf16.mxu0 %v2447_v14  ;;  %v718_v12 = vld [vmem:[#allocation2 + $0x668] sm:$0xff]  ;;  %vm508_vm4 = vcmp.lt.s32.totalorder %v504_v33, 16  ;;  %vm498_vm5 = vcmp.lt.s32.totalorder %v494_v19, 16 }
 0x252   :  { %1553 = vmatmul.mubr.msk.f32.gmra.mrb[12].mxu1 %vm448_vm2, %v2876_v17  ;;  %1555 = vmatmul.mubr.msk.f32.gmra.mrb[14].mxu0 %vm468_vm3, %v2880_v18  ;;  %v730_v17 = vld [vmem:[#allocation2 + $0x6c8] sm:$0xff]  ;;  %v2437_v24 = vpack.c.bf16 %v718_v12, %v717_v11  ;;  %vm488_vm6 = vcmp.lt.s32.totalorder %v484_v32, 16 }
 0x253   :  { %1267 = vmatprep.mubr.f32.mxu1 %v2912_v52  ;;  %2066 = vmatprep.mubr.f32.mxu0 %v2925_v45  ;;  %v746_v18 = vld [vmem:[#allocation2 + $0x748] sm:$0xff]  ;;  %v2427_v52 = vpack.c.bf16 %v730_v17, %v729_v10 }
 0x254   :  { %2418 = vmatpush3.bf16.msra.mxu1 %v2417_v28  ;;  %2450 = vmatpush3.bf16.msra.mxu0 %v2447_v14  ;;  %v2459_v45 = vpack.c.bf16 %v746_v18, %v745_v39  ;;  %v735_v14 = vld [vmem:[#allocation2 + $0x6f0] sm:$0xff] }
 0x255   :  { %2420 = vmatprep.subr.bf16.mxu1 %v2419_v29  ;;  %2452 = vmatprep.subr.bf16.mxu0 %v2451_v30  ;;  %v2439_v25 = vpack.c.bf16 %v736_v21, %v735_v14  ;;  %v719_v28 = vld [vmem:[#allocation2 + $0x670] sm:$0xff]  ;;  %v720_v29 = vld [vmem:[#allocation2 + $0x678] sm:$0xff] }
 0x258   :  { %2422 = vmatpush3.bf16.msra.mxu1 %v2421_v8  ;;  %2454 = vmatpush3.bf16.msra.mxu0 %v2451_v30  ;;  %v2441_v30 = vpack.c.bf16 %v720_v29, %v719_v28 }
 0x259   :  { %2424 = vmatprep.subr.bf16.mxu1 %v2423_v36  ;;  %2456 = vmatprep.subr.bf16.mxu0 %v2455_v37 }
 0x25c   :  { %2426 = vmatpush3.bf16.msra.mxu1 %v2425_v40  ;;  %2458 = vmatpush3.bf16.msra.mxu0 %v2455_v37 }
 0x25d   :  { %2428 = vmatprep.subr.bf16.mxu1 %v2427_v52  ;;  %2460 = vmatprep.subr.bf16.mxu0 %v2459_v45 }
 0x260   :  { %2430 = vmatpush3.bf16.msra.mxu1 %v2429_v62  ;;  %2462 = vmatpush3.bf16.msra.mxu0 %v2459_v45 }
 0x261   :  { %2432 = vmatprep.subr.bf16.mxu1 %v2431_v63  ;;  %2464 = vmatprep.subr.bf16.mxu0 %v2463_v1 }
 0x264   :  { %2434 = vmatpush3.bf16.msra.mxu1 %v2433_v5  ;;  %2466 = vmatpush3.bf16.msra.mxu0 %v2463_v1 }
 0x265   :  { %2436 = vmatprep.subr.bf16.mxu1 %v2435_v6  ;;  %2468 = vmatprep.subr.bf16.mxu0 %v2467_v55 }
 0x268   :  { %2438 = vmatpush3.bf16.msra.mxu1 %v2437_v24  ;;  %2470 = vmatpush3.bf16.msra.mxu0 %v2467_v55 }
 0x269   :  { %2440 = vmatprep.subr.bf16.mxu1 %v2439_v25  ;;  %2472 = vmatprep.subr.bf16.mxu0 %v2471_v27 }
 0x26c   :  { %2442 = vmatpush3.bf16.msra.mxu1 %v2441_v30  ;;  %2474 = vmatpush3.bf16.msra.mxu0 %v2471_v27 }
 0x26d   :  { %2475 = vmatprep.subr.bf16.mxu1 %v2562_v0  ;;  %2499 = vmatprep.subr.bf16.mxu0 %v2562_v0 }
 0x26f   :  { %1268 = vmatmul.mubr.f32.vlgmr.msra.gmra.mrb[14].mxu1 %v2921_v43  ;;  %2067 = vmatmul.mubr.msk.f32.vlgmr.msra.gmra.mrb[16].mxu0 %vm508_vm4, %v2917_v42 }
 0x270   :  { %1556 = vmatprep.mubr.msk.f32.mxu1 %vm498_vm5, %v2904_v34  ;;  %2477 = vmatpush3.bf16.msra.mxu1 %v2659_v16 }
 0x271   :  { %2501 = vmatpush3.bf16.msra.mxu0 %v2659_v16  ;;  %2478 = vmatprep.subr.bf16.mxu1 %v2562_v0 }
 0x272   :  { %2502 = vmatprep.subr.bf16.mxu0 %v2562_v0  ;;  %2136 = vmatprep.mubr.msk.f32.mxu0 %vm2563_vm0, %v2564_v51 }
 0x273   :  { %1557 = vmatmul.mubr.msk.f32.gmra.mrb[16].mxu1 %vm488_vm6, %v2908_v54 }
 0x274   :  { %2480 = vmatpush3.bf16.msra.mxu1 %v2668_v20  ;;  %2101 = vmatprep.mubr.msk.f32.mxu1 %vm2563_vm0, %v2564_v51 }
 0x275   :  { %2504 = vmatpush3.bf16.msra.mxu0 %v2668_v20  ;;  %2481 = vmatprep.subr.bf16.mxu1 %v2562_v0 }
 0x276   :  { %2505 = vmatprep.subr.bf16.mxu0 %v2562_v0 }
 0x278   :  { %2483 = vmatpush3.bf16.msra.mxu1 %v2684_v26 }
 0x279   :  { %2507 = vmatpush3.bf16.msra.mxu0 %v2684_v26  ;;  %2484 = vmatprep.subr.bf16.mxu1 %v2562_v0 }
 0x27a   :  { %2508 = vmatprep.subr.bf16.mxu0 %v2562_v0 }
 0x27c   :  { %2486 = vmatpush3.bf16.msra.mxu1 %v2697_v31 }
 0x27d   :  { %2510 = vmatpush3.bf16.msra.mxu0 %v2697_v31  ;;  %2487 = vmatprep.subr.bf16.mxu1 %v2562_v0 }
 0x27e   :  { %2511 = vmatprep.subr.bf16.mxu0 %v2562_v0 }
 0x280   :  { %2489 = vmatpush3.bf16.msra.mxu1 %v2732_v41 }
 0x281   :  { %2513 = vmatpush3.bf16.msra.mxu0 %v2732_v41  ;;  %2490 = vmatprep.subr.bf16.mxu1 %v2562_v0 }
 0x282   :  { %2514 = vmatprep.subr.bf16.mxu0 %v2562_v0 }
 0x284   :  { %2492 = vmatpush3.bf16.msra.mxu1 %v2744_v44 }
 0x285   :  { %2516 = vmatpush3.bf16.msra.mxu0 %v2744_v44  ;;  %2493 = vmatprep.subr.bf16.mxu1 %v2562_v0 }
 0x286   :  { %2517 = vmatprep.subr.bf16.mxu0 %v2562_v0 }
 0x288   :  { %2495 = vmatpush3.bf16.msra.mxu1 %v2756_v47 }
 0x289   :  { %2519 = vmatpush3.bf16.msra.mxu0 %v2756_v47  ;;  %2496 = vmatprep.subr.bf16.mxu1 %v2562_v0 }
 0x28a   :  { %2520 = vmatprep.subr.bf16.mxu0 %v2562_v0 }
 0x28c   :  { %2498 = vmatpush3.bf16.msra.mxu1 %v2768_v50 }
 0x28d   :  { %2522 = vmatpush3.bf16.msra.mxu0 %v2768_v50 }
 0x2e0   :  { %v1643_v16 = vpop.f32.mrb[2].mxu1  ;;  %v1681_v20 = vpop.f32.mrb[4].mxu0 }
 0x2e1   :  { %v1644_v26 = vpop.f32.mrb[3].mxu1  ;;  %v1682_v31 = vpop.f32.mrb[5].mxu0 }
 0x2e2   :  { %v1645_v41 = vadd.f32 %v1644_v26, %v1643_v16  ;;  %v1683_v44 = vadd.f32 %v1682_v31, %v1681_v20 }
 0x2e4   :  { %v895_v51 = vadd.f32 %v1683_v44, %v1645_v41  ;;  %v1646_v34 = vpop.f32.mrb[4].mxu1  ;;  %v1684_v54 = vpop.f32.mrb[6].mxu0 }
 0x2e5   :  { %v1647_v42 = vpop.f32.mrb[5].mxu1  ;;  %v1685_v43 = vpop.f32.mrb[7].mxu0 }
 0x2e6   :  { %v1648_v47 = vadd.f32 %v1647_v42, %v1646_v34  ;;  %v1686_v48 = vadd.f32 %v1685_v43, %v1684_v54 }
 0x2e8   :  { %v900_v22 = vadd.f32 %v1686_v48, %v1648_v47 }
 0x300   :  { %v1719_v7 = vpop.f32.mrb[6].mxu1  ;;  %v1757_v0 = vpop.f32.mrb[8].mxu0 }
 0x301   :  { %v1720_v35 = vpop.f32.mrb[7].mxu1  ;;  %v1758_v8 = vpop.f32.mrb[9].mxu0 }
 0x302   :  { %v1721_v36 = vadd.f32 %v1720_v35, %v1719_v7  ;;  %v1759_v50 = vadd.f32 %v1758_v8, %v1757_v0 }
 0x304   :  { %v970_v37 = vadd.f32 %v1721_v36, %v895_v51  ;;  %v1722_v38 = vpop.f32.mrb[8].mxu1  ;;  %v1760_v9 = vpop.f32.mrb[10].mxu0  ;;  %v1511_v36 = vld [vmem:[%s3025_s6] sm:$0x1] }
 0x305   :  { %v1723_v10 = vpop.f32.mrb[9].mxu1  ;;  %v1761_v17 = vpop.f32.mrb[11].mxu0 }
 0x306   :  { %v1045_v39 = vadd.f32 %v1759_v50, %v970_v37  ;;  %v1724_v18 = vadd.f32 %v1723_v10, %v1722_v38  ;;  %v1762_v40 = vadd.f32 %v1761_v17, %v1760_v9  ;;  %v1515_v38 = vld [vmem:[%s3026_s7] sm:$0x1] }
 0x308   :  { %v975_v52 = vadd.f32 %v1724_v18, %v900_v22 }
 0x30a   :  { %v1050_v45 = vadd.f32 %v1762_v40, %v975_v52 }
 0x321   :  { %v1795_v46 = vpop.f32.mrb[10].mxu1  ;;  %v1833_v49 = vpop.f32.mrb[12].mxu0 }
 0x322   :  { %v1796_v53 = vpop.f32.mrb[11].mxu1  ;;  %v1834_v57 = vpop.f32.mrb[13].mxu0 }
 0x323   :  { %v1797_v60 = vadd.f32 %v1796_v53, %v1795_v46  ;;  %v1835_v61 = vadd.f32 %v1834_v57, %v1833_v49  ;;  %v2533_v46 = vld [vmem:[%s3019_s0] sm:$0xff]  ;;  %v2534_v53 = vld [vmem:[%s3019_s0 + $0x8] sm:$0xff] }
 0x325   :  { %v1120_v62 = vadd.f32 %v1797_v60, %v1045_v39  ;;  %v1798_v63 = vpop.f32.mrb[12].mxu1  ;;  %v1836_v1 = vpop.f32.mrb[14].mxu0 }
 0x326   :  { %v1799_v2 = vpop.f32.mrb[13].mxu1  ;;  %v1837_v3 = vpop.f32.mrb[15].mxu0 }
 0x327   :  { %v1195_v58 = vadd.f32 %v1835_v61, %v1120_v62  ;;  %v1800_v59 = vadd.f32 %v1799_v2, %v1798_v63  ;;  %v1838_v13 = vadd.f32 %v1837_v3, %v1836_v1 }
 0x329   :  { %v1125_v4 = vadd.f32 %v1800_v59, %v1050_v45 }
 0x32b   :  { %v1200_v5 = vadd.f32 %v1838_v13, %v1125_v4 }
 0x342   :  { %v1871_v6 = vpop.f32.mrb[14].mxu1  ;;  %v2068_v55 = vpop.f32.mrb[16].mxu0 }
 0x343   :  { %v1872_v11 = vpop.f32.mrb[15].mxu1  ;;  %v1344_v12 = vpop.f32.mrb[17].mxu0 }
 0x344   :  { %v1873_v14 = vadd.f32 %v1872_v11, %v1871_v6 }
 0x346   :  { %v1270_v21 = vadd.f32 %v1873_v14, %v1195_v58  ;;  %v1874_v23 = vpop.f32.mrb[16].mxu1 }
 0x347   :  { %v1875_v56 = vpop.f32.mrb[17].mxu1 }
 0x348   :  { %v1345_v24 = vadd.f32 %v1344_v12, %v1270_v21  ;;  %v1876_v25 = vadd.f32 %v1875_v56, %v1874_v23 }
 0x34a   :  { %v1275_v27 = vadd.f32 %v1876_v25, %v1200_v5  ;;  %v1360_v29 = vmul.f32 %v1345_v24, %v1345_v24 }
 0x34c   :  { %v1350_v28 = vadd.f32 %v2068_v55, %v1275_v27 }
 0x34e   :  { %v1353_v30 = vadd.f32 %v1350_v28, %v1345_v24  ;;  %v1361_v33 = vmul.f32 %v1350_v28, %v1350_v28 }
 0x350   :  { %v1354_v19 = vrot.slane %v1353_v30, 4  ;;  %v1362_v32 = vadd.f32 %v1361_v33, %v1360_v29 }
 0x352   :  { %v1355_v16 = vadd.f32 %v1354_v19, %v1353_v30  ;;  %v1363_v20 = vrot.slane %v1362_v32, 4 }
 0x354   :  { %v1356_v26 = vrot.slane %v1355_v16, 2  ;;  %v1364_v31 = vadd.f32 %v1363_v20, %v1362_v32 }
 0x356   :  { %v1357_v41 = vadd.f32 %v1356_v26, %v1355_v16  ;;  %v1365_v44 = vrot.slane %v1364_v31, 2 }
 0x358   :  { %v1358_v51 = vrot.slane %v1357_v41, 1  ;;  %v1366_v34 = vadd.f32 %v1365_v44, %v1364_v31 }
 0x35a   :  { %v1359_v54 = vadd.f32 %v1358_v51, %v1357_v41  ;;  %v1367_v42 = vrot.slane %v1366_v34, 1 }
 0x35c   :  { %2102 = vmatmul.mubr.f32.vlgmr.msra.gmra.mrb[18].mxu1 %v1359_v54  ;;  %v1368_v43 = vadd.f32 %v1367_v42, %v1366_v34 }
 0x35e   :  { %2137 = vmatmul.mubr.f32.vlgmr.msra.gmra.mrb[18].mxu0 %v1368_v43 }
 0x42f   :  { %v1435_v47 = vpop.f32.mrb[18].mxu1 }
 0x430   :  { %v1509_v48 = vmul.f32 %v1435_v47, %v1435_v47  ;;  %v2103_v22 = vpop.f32.mrb[19].mxu1 }
 0x431   :  { %v1505_v7 = vpop.f32.mrb[18].mxu0 }
 0x432   :  { %v1510_v0 = vsub.f32 %v1505_v7, %v1509_v48  ;;  %v2138_v35 = vpop.f32.mrb[19].mxu0 }
 0x434   :  { %v1512_v8 = vadd.f32 1e-05, %v1510_v0 }
 0x436   :  { %2531 = vrsqrt.f32 %v1512_v8 }
 0x440   :  { %v2532_v50 = vpop.eup %2531 }
 0x441   :  { %v1514_v37 = vmul.f32 %v2532_v50, %v1511_v36 }
 0x443   :  { %v1516_v9 = vmul.f32 %v1514_v37, %v1435_v47  ;;  %v1522_v10 = vrot.slane %v1514_v37, %v2792_v15 }
 0x445   :  { %v1517_v17 = vsub.f32 %v1515_v38, %v1516_v9  ;;  %v1524_v39 = vmul.f32 %v1522_v10, %v1345_v24  ;;  %v1525_v18 = vmul.f32 %v1522_v10, %v1350_v28 }
 0x447   :  { %v1530_v40 = vrot.slane %v1517_v17, %v2792_v15 }
 0x449   :  { %v1532_v52 = vadd.f32 %v1530_v40, %v1524_v39  ;;  %v1533_v45 = vadd.f32 %v1530_v40, %v1525_v18 }
 0x44b   :  { %v1534_v49 = vadd.f32 %v2533_v46, %v1532_v52  ;;  %v1535_v57 = vadd.f32 %v2534_v53, %v1533_v45 }
 0x44d   :  { %v1536_v60 = vmax.f32 %v1534_v49, 0.0  ;;  %v1537_v61 = vmax.f32 %v1535_v57, 0.0 }
 0x44f   :  { %1538 = vst [vmem:[%s3027_s8] sm:$0xff] %v1536_v60  ;;  %1539 = vst [vmem:[%s3027_s8 + $0x8] sm:$0xff] %v1537_v61 }
 0x450   :  { %1544 = vsyncpa [#allocation3], 1 }

</bundles_post_ra>
